<compile_context>
chip_gen: v7x
topology: tpu7x:2x2x1
jax: 0.10.0
libtpu: 0.0.40
codegen_flags: <defaults>
</compile_context>

<pallas_src>
import jax
import jax.numpy as jnp
from jax.experimental import pallas as pl
from jax.experimental.pallas import tpu as pltpu

LANE = 128      # TPU lane width (last-dim tiling granularity)
SUBLANE = 8     # f32 sublane granularity


def _round_up(n: int, m: int) -> int:
    return ((n + m - 1) // m) * m


def pinn_kernel(x_ref,
                w_in_ref, b_in_ref,
                w_fc1_ref, b_fc1_ref,
                w_hid_ref, b_hid_ref,
                w_fc2_ref, b_fc2_ref,
                w_out_ref, b_out_ref,
                o_ref):
    """Feature-major MLP: every activation is [features, batch_tile]."""
    compute_dtype = w_fc1_ref.dtype      # bf16 fast path or f32

    x = x_ref[...]                       # (in_dim, tb) float32
    in_dim = x.shape[0]

    # ---- Layer 1: Linear(in_dim, 64) + relu, kept in f32 on the VPU.
    # K = in_dim (= 4) would be a degenerate MXU operand; rank-1 FMAs are
    # effectively free (VPU slack) and keep the raw coordinates in f32.
    w_in = w_in_ref[...]                 # (64, in_dim) float32
    h = b_in_ref[...]                    # (64, 1) float32, broadcasts over lanes
    for k in range(in_dim):              # static unroll (in_dim is tiny)
        h = h + w_in[:, k:k + 1] * x[k:k + 1, :]
    h = jnp.maximum(h, 0.0).astype(compute_dtype)            # (64, tb)

    def dense_relu(w_ref, b_ref, a):
        z = jnp.dot(w_ref[...], a, preferred_element_type=jnp.float32)
        z = z + b_ref[...]               # f32 bias on the f32 accumulator
        return jnp.maximum(z, 0.0).astype(compute_dtype)

    h = dense_relu(w_fc1_ref, b_fc1_ref, h)                   # (256, tb)
    h = dense_relu(w_hid_ref, b_hid_ref, h)                   # (256, tb)
    h = dense_relu(w_fc2_ref, b_fc2_ref, h)                   # (64, tb)

    # ---- Output layer: Linear(64, out); rows zero-padded to a sublane multiple.
    z = jnp.dot(w_out_ref[...], h, preferred_element_type=jnp.float32)
    o_ref[...] = (z + b_out_ref[...]).astype(o_ref.dtype)     # (out_rows, tb)


def prepare_params(params, *, compute_dtype=jnp.bfloat16):
    """One-time weight preparation (hoisted out of the per-call path).

    Transposes weights to feature-major [out_features, in_features], reshapes
    biases to [out_features, 1], zero-pads the output layer rows to a sublane
    multiple, and casts the MXU layers to `compute_dtype` (bf16 default =
    native MXU rate on v5e/v6e/v7x; accumulation stays f32).  Layer 1 weights
    and all biases stay float32.
    """
    in_dim = params["w_in"].shape[0]
    out_dim = params["w_out"].shape[1]
    out_rows = _round_up(out_dim, SUBLANE)

    def w_t(name, dtype):
        return jnp.asarray(params[f"w_{name}"].T, dtype)       # (out_f, in_f)

    def b_t(name):
        return jnp.asarray(params[f"b_{name}"], jnp.float32).reshape(-1, 1)

    w_out_t = jnp.zeros((out_rows, params["w_out"].shape[0]), compute_dtype)
    w_out_t = w_out_t.at[:out_dim, :].set(params["w_out"].T.astype(compute_dtype))
    b_out_t = jnp.zeros((out_rows, 1), jnp.float32)
    b_out_t = b_out_t.at[:out_dim, :].set(
        jnp.asarray(params["b_out"], jnp.float32).reshape(-1, 1))

    return dict(
        weights=(
            w_t("in", jnp.float32), b_t("in"),      # layer 1 stays f32 (VPU FMAs)
            w_t("fc1", compute_dtype), b_t("fc1"),
            w_t("hid", compute_dtype), b_t("hid"),
            w_t("fc2", compute_dtype), b_t("fc2"),
            w_out_t, b_out_t,
        ),
        in_dim=in_dim,
        out_dim=out_dim,
        out_rows=out_rows,
        compute_dtype=jnp.dtype(compute_dtype),
    )


def pinn_forward(x, prepared, *, block_b: int = 2048):
    """Run the PINN forward pass.

    x: [B, input_dim] float32 collocation points.
    prepared: output of prepare_params().
    block_b: batch rows per grid step (rounded to the 128-lane width).
      2048 amortizes the ~0.35us/step pipeline overhead on all generations.
      VMEM guidance: bf16 compute fits block_b up to ~8192 everywhere; with
      f32 compute keep block_b <= ~4096 on v7x (64 MiB physical VMEM per TC).
      The scoped-VMEM limit is set from the tile size below, so large tiles
      also work under v5e's 16 MiB default.
    """
    B, in_dim = x.shape
    assert in_dim == prepared["in_dim"], "input_dim mismatch with prepared params"
    out_dim = prepared["out_dim"]
    out_rows = prepared["out_rows"]
    weights = prepared["weights"]

    # Batch tiling: tb is a multiple of the 128-lane width; capping it at
    # ceil(B/2) keeps >=2 grid steps so v7x can shard the (parallel) grid over
    # both TensorCores even for medium batches.
    block_b = _round_up(max(block_b, LANE), LANE)
    two_step = _round_up(max(-(-B // 2), 1), LANE)
    tb = min(block_b, two_step)
    b_pad = _round_up(B, tb)
    grid = (b_pad // tb,)

    # Feature-major x: (in_dim, b_pad), batch on the lane axis (lane-dense tile).
    x_t = jnp.pad(x.astype(jnp.float32).T, ((0, 0), (0, b_pad - B)))

    # Weights/biases get constant index_maps -> pinned VMEM-resident.
    def pinned_spec(a):
        return pl.BlockSpec(a.shape, lambda i, _nd=a.ndim: (0,) * _nd)

    in_specs = [pl.BlockSpec((in_dim, tb), lambda i: (0, i))]
    in_specs += [pinned_spec(a) for a in weights]
    out_spec = pl.BlockSpec((out_rows, tb), lambda i: (0, i))

    # Scoped-VMEM budget: pinned weights + double-buffered x/out tiles + live
    # f32 activations.  Clamp to [32 MiB, 64 MiB] (v5e's default is only 16 MiB).
    est_vmem = (4 * 1024 * 1024
                + 4 * (max(in_dim, SUBLANE) + out_rows) * tb * 4
                + 8 * 256 * tb * 4)
    vmem_limit = int(max(32 * 1024 * 1024, min(est_vmem, 64 * 1024 * 1024)))

    flops = 2 * b_pad * (in_dim * 64 + 64 * 256 + 256 * 256 + 256 * 64 + 64 * out_rows)
    bytes_accessed = (x_t.size * x_t.dtype.itemsize
                      + sum(a.size * a.dtype.itemsize for a in weights)
                      + out_rows * b_pad * 4)

    out_t = pl.pallas_call(
        pinn_kernel,
        out_shape=jax.ShapeDtypeStruct((out_rows, b_pad), jnp.float32),
        grid=grid,
        in_specs=in_specs,
        out_specs=out_spec,
        compiler_params=pltpu.CompilerParams(
            dimension_semantics=("parallel",),
            vmem_limit_bytes=vmem_limit),
        cost_estimate=pl.CostEstimate(
            flops=flops, transcendentals=0, bytes_accessed=bytes_accessed),
    )(x_t, *weights)

    # Strip output-row padding and batch padding; back to [B, out_dim].
    return out_t[:out_dim, :B].T


def init_params(key, input_dim, output_dim):
    """Deterministic init mimicking PyTorch Linear default (uniform +/- 1/sqrt(fan_in)).
    Weights are stored [in_features, out_features]; biases [1, out_features]."""
    dims = [
        ("in", input_dim, 64),
        ("fc1", 64, 256),
        ("hid", 256, 256),
        ("fc2", 256, 64),
        ("out", 64, output_dim),
    ]
    params = {}
    for name, fan_in, fan_out in dims:
        key, kw, kb = jax.random.split(key, 3)
        bound = 1.0 / jnp.sqrt(jnp.float32(fan_in))
        params[f"w_{name}"] = jax.random.uniform(
            kw, (fan_in, fan_out), jnp.float32, -bound, bound)
        params[f"b_{name}"] = jax.random.uniform(
            kb, (1, fan_out), jnp.float32, -bound, bound)
    return params


def reference_forward(x, params):
    """Plain-JAX reference for sanity checking."""
    h = jnp.maximum(x @ params["w_in"] + params["b_in"], 0.0)
    h = jnp.maximum(h @ params["w_fc1"] + params["b_fc1"], 0.0)
    h = jnp.maximum(h @ params["w_hid"] + params["b_hid"], 0.0)
    h = jnp.maximum(h @ params["w_fc2"] + params["b_fc2"], 0.0)
    return h @ params["w_out"] + params["b_out"]


if __name__ == "__main__":
    key = jax.random.PRNGKey(0)
    input_dim, output_dim = 4, 2

    params = init_params(jax.random.fold_in(key, 0), input_dim, output_dim)

    # 1) f32 compute path, single grid step, tight tolerance.
    prep_f32 = prepare_params(params, compute_dtype=jnp.float32)
    x_small = jax.random.normal(jax.random.fold_in(key, 1), (8, input_dim), jnp.float32)
    out_small = jax.block_until_ready(pinn_forward(x_small, prep_f32))
    ref_small = reference_forward(x_small, params)
    assert out_small.shape == (8, output_dim)
    assert jnp.allclose(out_small, ref_small, atol=1e-4, rtol=1e-4), "f32 small-batch mismatch"

    # 2) f32 path with a batch that exercises the multi-step grid + padding
    #    (B=300 -> tb=256, b_pad=512, grid=(2,) via the ceil(B/2) cap).
    x_big = jax.random.normal(jax.random.fold_in(key, 2), (300, input_dim), jnp.float32)
    out_big = jax.block_until_ready(pinn_forward(x_big, prep_f32))
    ref_big = reference_forward(x_big, params)
    assert out_big.shape == (300, output_dim)
    assert jnp.allclose(out_big, ref_big, atol=1e-4, rtol=1e-4), "f32 tiled-batch mismatch"

    # 3) Default bf16 MXU path (f32 layer 1 + f32 accumulation), loose tolerance.
    prep_bf16 = prepare_params(params)   # compute_dtype defaults to bfloat16
    out_bf16 = jax.block_until_ready(pinn_forward(x_big, prep_bf16))
    assert out_bf16.shape == (300, output_dim)
    assert jnp.allclose(out_bf16, ref_big, atol=1e-1, rtol=1e-1), "bf16 path mismatch"

    print("KERNEL_OK")
</pallas_src>

<mosaic_0001>
module attributes {stable_mosaic.version = 11 : i64} {
  func.func @pinn_kernel(%arg0: i32, %arg1: memref<4x128xf32, #tpu.memory_space<vmem>>, %arg2: memref<64x4xf32, #tpu.memory_space<vmem>>, %arg3: memref<64x1xf32, #tpu.memory_space<vmem>>, %arg4: memref<256x64xf32, #tpu.memory_space<vmem>>, %arg5: memref<256x1xf32, #tpu.memory_space<vmem>>, %arg6: memref<256x256xf32, #tpu.memory_space<vmem>>, %arg7: memref<256x1xf32, #tpu.memory_space<vmem>>, %arg8: memref<64x256xf32, #tpu.memory_space<vmem>>, %arg9: memref<64x1xf32, #tpu.memory_space<vmem>>, %arg10: memref<8x64xf32, #tpu.memory_space<vmem>>, %arg11: memref<8x1xf32, #tpu.memory_space<vmem>>, %arg12: memref<8x128xf32, #tpu.memory_space<vmem>>) attributes {dimension_semantics = [#tpu.dimension_semantics<parallel>], iteration_bounds = array<i64: 1>, scalar_prefetch = 0 : i64, scratch_operands = 0 : i64, tpu.core_type = #tpu.core_type<tc>, window_params = [{transform_indices = @transform_0, window_bounds = array<i64: 4, 128>}, {pipeline_mode = #tpu.pipeline_mode<synchronous>, transform_indices = @transform_1, window_bounds = array<i64: 64, 4>}, {pipeline_mode = #tpu.pipeline_mode<synchronous>, transform_indices = @transform_2, window_bounds = array<i64: 64, 1>}, {pipeline_mode = #tpu.pipeline_mode<synchronous>, transform_indices = @transform_3, window_bounds = array<i64: 256, 64>}, {pipeline_mode = #tpu.pipeline_mode<synchronous>, transform_indices = @transform_4, window_bounds = array<i64: 256, 1>}, {pipeline_mode = #tpu.pipeline_mode<synchronous>, transform_indices = @transform_5, window_bounds = array<i64: 256, 256>}, {pipeline_mode = #tpu.pipeline_mode<synchronous>, transform_indices = @transform_6, window_bounds = array<i64: 256, 1>}, {pipeline_mode = #tpu.pipeline_mode<synchronous>, transform_indices = @transform_7, window_bounds = array<i64: 64, 256>}, {pipeline_mode = #tpu.pipeline_mode<synchronous>, transform_indices = @transform_8, window_bounds = array<i64: 64, 1>}, {pipeline_mode = #tpu.pipeline_mode<synchronous>, transform_indices = @transform_9, window_bounds = array<i64: 8, 64>}, {pipeline_mode = #tpu.pipeline_mode<synchronous>, transform_indices = @transform_10, window_bounds = array<i64: 8, 1>}, {transform_indices = @transform_11, window_bounds = array<i64: 8, 128>}]} {
    %c0 = arith.constant 0 : index
    %c0_0 = arith.constant 0 : index
    %0 = vector.load %arg1[%c0, %c0_0] : memref<4x128xf32, #tpu.memory_space<vmem>>, vector<4x128xf32>
    %c0_1 = arith.constant 0 : index
    %c0_2 = arith.constant 0 : index
    %1 = vector.load %arg2[%c0_1, %c0_2] : memref<64x4xf32, #tpu.memory_space<vmem>>, vector<64x4xf32>
    %c0_3 = arith.constant 0 : index
    %c0_4 = arith.constant 0 : index
    %2 = vector.load %arg3[%c0_3, %c0_4] : memref<64x1xf32, #tpu.memory_space<vmem>>, vector<64x1xf32>
    %3 = vector.extract_strided_slice %1 {offsets = [0, 0], sizes = [64, 1], strides = [1, 1]} : vector<64x4xf32> to vector<64x1xf32>
    %4 = vector.extract_strided_slice %0 {offsets = [0, 0], sizes = [1, 128], strides = [1, 1]} : vector<4x128xf32> to vector<1x128xf32>
    %5 = vector.broadcast %3 : vector<64x1xf32> to vector<64x128xf32>
    %6 = vector.broadcast %4 : vector<1x128xf32> to vector<64x128xf32>
    %7 = arith.mulf %5, %6 : vector<64x128xf32>
    %8 = vector.broadcast %2 : vector<64x1xf32> to vector<64x128xf32>
    %9 = arith.addf %8, %7 : vector<64x128xf32>
    %10 = vector.extract_strided_slice %1 {offsets = [0, 1], sizes = [64, 1], strides = [1, 1]} : vector<64x4xf32> to vector<64x1xf32>
    %11 = vector.extract_strided_slice %0 {offsets = [1, 0], sizes = [1, 128], strides = [1, 1]} : vector<4x128xf32> to vector<1x128xf32>
    %12 = vector.broadcast %10 : vector<64x1xf32> to vector<64x128xf32>
    %13 = vector.broadcast %11 : vector<1x128xf32> to vector<64x128xf32>
    %14 = arith.mulf %12, %13 : vector<64x128xf32>
    %15 = arith.addf %9, %14 : vector<64x128xf32>
    %16 = vector.extract_strided_slice %1 {offsets = [0, 2], sizes = [64, 1], strides = [1, 1]} : vector<64x4xf32> to vector<64x1xf32>
    %17 = vector.extract_strided_slice %0 {offsets = [2, 0], sizes = [1, 128], strides = [1, 1]} : vector<4x128xf32> to vector<1x128xf32>
    %18 = vector.broadcast %16 : vector<64x1xf32> to vector<64x128xf32>
    %19 = vector.broadcast %17 : vector<1x128xf32> to vector<64x128xf32>
    %20 = arith.mulf %18, %19 : vector<64x128xf32>
    %21 = arith.addf %15, %20 : vector<64x128xf32>
    %22 = vector.extract_strided_slice %1 {offsets = [0, 3], sizes = [64, 1], strides = [1, 1]} : vector<64x4xf32> to vector<64x1xf32>
    %23 = vector.extract_strided_slice %0 {offsets = [3, 0], sizes = [1, 128], strides = [1, 1]} : vector<4x128xf32> to vector<1x128xf32>
    %24 = vector.broadcast %22 : vector<64x1xf32> to vector<64x128xf32>
    %25 = vector.broadcast %23 : vector<1x128xf32> to vector<64x128xf32>
    %26 = arith.mulf %24, %25 : vector<64x128xf32>
    %27 = arith.addf %21, %26 : vector<64x128xf32>
    %cst = arith.constant 0.000000e+00 : f32
    %28 = vector.broadcast %cst : f32 to vector<64x128xf32>
    %29 = arith.maximumf %27, %28 : vector<64x128xf32>
    %c0_5 = arith.constant 0 : index
    %c0_6 = arith.constant 0 : index
    %30 = vector.load %arg4[%c0_5, %c0_6] : memref<256x64xf32, #tpu.memory_space<vmem>>, vector<256x64xf32>
    %cst_7 = arith.constant dense<0.000000e+00> : vector<256x128xf32>
    %31 = tpu.matmul %30, %29, %cst_7 {dimension_numbers = #tpu.dot_dimension_numbers<[1], [0], [0], [1], [0, 0, 1, 1], [], []>} : vector<256x64xf32>, vector<64x128xf32>, vector<256x128xf32> -> vector<256x128xf32>
    %c0_8 = arith.constant 0 : index
    %c0_9 = arith.constant 0 : index
    %32 = vector.load %arg5[%c0_8, %c0_9] : memref<256x1xf32, #tpu.memory_space<vmem>>, vector<256x1xf32>
    %33 = vector.broadcast %32 : vector<256x1xf32> to vector<256x128xf32>
    %34 = arith.addf %31, %33 : vector<256x128xf32>
    %cst_10 = arith.constant 0.000000e+00 : f32
    %35 = vector.broadcast %cst_10 : f32 to vector<256x128xf32>
    %36 = arith.maximumf %34, %35 : vector<256x128xf32>
    %c0_11 = arith.constant 0 : index
    %c0_12 = arith.constant 0 : index
    %37 = vector.load %arg6[%c0_11, %c0_12] : memref<256x256xf32, #tpu.memory_space<vmem>>, vector<256x256xf32>
    %cst_13 = arith.constant dense<0.000000e+00> : vector<256x128xf32>
    %38 = tpu.matmul %37, %36, %cst_13 {dimension_numbers = #tpu.dot_dimension_numbers<[1], [0], [0], [1], [0, 0, 1, 1], [], []>} : vector<256x256xf32>, vector<256x128xf32>, vector<256x128xf32> -> vector<256x128xf32>
    %c0_14 = arith.constant 0 : index
    %c0_15 = arith.constant 0 : index
    %39 = vector.load %arg7[%c0_14, %c0_15] : memref<256x1xf32, #tpu.memory_space<vmem>>, vector<256x1xf32>
    %40 = vector.broadcast %39 : vector<256x1xf32> to vector<256x128xf32>
    %41 = arith.addf %38, %40 : vector<256x128xf32>
    %cst_16 = arith.constant 0.000000e+00 : f32
    %42 = vector.broadcast %cst_16 : f32 to vector<256x128xf32>
    %43 = arith.maximumf %41, %42 : vector<256x128xf32>
    %c0_17 = arith.constant 0 : index
    %c0_18 = arith.constant 0 : index
    %44 = vector.load %arg8[%c0_17, %c0_18] : memref<64x256xf32, #tpu.memory_space<vmem>>, vector<64x256xf32>
    %cst_19 = arith.constant dense<0.000000e+00> : vector<64x128xf32>
    %45 = tpu.matmul %44, %43, %cst_19 {dimension_numbers = #tpu.dot_dimension_numbers<[1], [0], [0], [1], [0, 0, 1, 1], [], []>} : vector<64x256xf32>, vector<256x128xf32>, vector<64x128xf32> -> vector<64x128xf32>
    %c0_20 = arith.constant 0 : index
    %c0_21 = arith.constant 0 : index
    %46 = vector.load %arg9[%c0_20, %c0_21] : memref<64x1xf32, #tpu.memory_space<vmem>>, vector<64x1xf32>
    %47 = vector.broadcast %46 : vector<64x1xf32> to vector<64x128xf32>
    %48 = arith.addf %45, %47 : vector<64x128xf32>
    %cst_22 = arith.constant 0.000000e+00 : f32
    %49 = vector.broadcast %cst_22 : f32 to vector<64x128xf32>
    %50 = arith.maximumf %48, %49 : vector<64x128xf32>
    %c0_23 = arith.constant 0 : index
    %c0_24 = arith.constant 0 : index
    %51 = vector.load %arg10[%c0_23, %c0_24] : memref<8x64xf32, #tpu.memory_space<vmem>>, vector<8x64xf32>
    %cst_25 = arith.constant dense<0.000000e+00> : vector<8x128xf32>
    %52 = tpu.matmul %51, %50, %cst_25 {dimension_numbers = #tpu.dot_dimension_numbers<[1], [0], [0], [1], [0, 0, 1, 1], [], []>} : vector<8x64xf32>, vector<64x128xf32>, vector<8x128xf32> -> vector<8x128xf32>
    %c0_26 = arith.constant 0 : index
    %c0_27 = arith.constant 0 : index
    %53 = vector.load %arg11[%c0_26, %c0_27] : memref<8x1xf32, #tpu.memory_space<vmem>>, vector<8x1xf32>
    %54 = vector.broadcast %53 : vector<8x1xf32> to vector<8x128xf32>
    %55 = arith.addf %52, %54 : vector<8x128xf32>
    %c0_28 = arith.constant 0 : index
    %c0_29 = arith.constant 0 : index
    %56 = vector.load %arg12[%c0_28, %c0_29] : memref<8x128xf32, #tpu.memory_space<vmem>>, vector<8x128xf32>
    tpu.vector_store %arg12[%c0_28, %c0_29], %55 {strides = array<i32>} : memref<8x128xf32, #tpu.memory_space<vmem>>, vector<8x128xf32>,
    return
  }
  func.func @transform_0(%arg0: i32) -> (i32, i32) {
    %c0_i32 = arith.constant 0 : i32
    %c0_i32_0 = arith.constant 0 : i32
    return %c0_i32, %arg0 : i32, i32
  }
  func.func @transform_1(%arg0: i32) -> (i32, i32) {
    %c0_i32 = arith.constant 0 : i32
    %c0_i32_0 = arith.constant 0 : i32
    %c0_i32_1 = arith.constant 0 : i32
    return %c0_i32, %c0_i32_0 : i32, i32
  }
  func.func @transform_2(%arg0: i32) -> (i32, i32) {
    %c0_i32 = arith.constant 0 : i32
    %c0_i32_0 = arith.constant 0 : i32
    %c0_i32_1 = arith.constant 0 : i32
    return %c0_i32, %c0_i32_0 : i32, i32
  }
  func.func @transform_3(%arg0: i32) -> (i32, i32) {
    %c0_i32 = arith.constant 0 : i32
    %c0_i32_0 = arith.constant 0 : i32
    %c0_i32_1 = arith.constant 0 : i32
    return %c0_i32, %c0_i32_0 : i32, i32
  }
  func.func @transform_4(%arg0: i32) -> (i32, i32) {
    %c0_i32 = arith.constant 0 : i32
    %c0_i32_0 = arith.constant 0 : i32
    %c0_i32_1 = arith.constant 0 : i32
    return %c0_i32, %c0_i32_0 : i32, i32
  }
  func.func @transform_5(%arg0: i32) -> (i32, i32) {
    %c0_i32 = arith.constant 0 : i32
    %c0_i32_0 = arith.constant 0 : i32
    %c0_i32_1 = arith.constant 0 : i32
    return %c0_i32, %c0_i32_0 : i32, i32
  }
  func.func @transform_6(%arg0: i32) -> (i32, i32) {
    %c0_i32 = arith.constant 0 : i32
    %c0_i32_0 = arith.constant 0 : i32
    %c0_i32_1 = arith.constant 0 : i32
    return %c0_i32, %c0_i32_0 : i32, i32
  }
  func.func @transform_7(%arg0: i32) -> (i32, i32) {
    %c0_i32 = arith.constant 0 : i32
    %c0_i32_0 = arith.constant 0 : i32
    %c0_i32_1 = arith.constant 0 : i32
    return %c0_i32, %c0_i32_0 : i32, i32
  }
  func.func @transform_8(%arg0: i32) -> (i32, i32) {
    %c0_i32 = arith.constant 0 : i32
    %c0_i32_0 = arith.constant 0 : i32
    %c0_i32_1 = arith.constant 0 : i32
    return %c0_i32, %c0_i32_0 : i32, i32
  }
  func.func @transform_9(%arg0: i32) -> (i32, i32) {
    %c0_i32 = arith.constant 0 : i32
    %c0_i32_0 = arith.constant 0 : i32
    %c0_i32_1 = arith.constant 0 : i32
    return %c0_i32, %c0_i32_0 : i32, i32
  }
  func.func @transform_10(%arg0: i32) -> (i32, i32) {
    %c0_i32 = arith.constant 0 : i32
    %c0_i32_0 = arith.constant 0 : i32
    %c0_i32_1 = arith.constant 0 : i32
    return %c0_i32, %c0_i32_0 : i32, i32
  }
  func.func @transform_11(%arg0: i32) -> (i32, i32) {
    %c0_i32 = arith.constant 0 : i32
    %c0_i32_0 = arith.constant 0 : i32
    return %c0_i32, %arg0 : i32, i32
  }
}

</mosaic_0001>

<bundles_post_ra>
// kernel: tpu_custom_call.1
= control target key start
LH: loop header
LB: loop body
LE: loop exit
PB: predicated region body
PF: predicated region fallthrough
CT: control target
= control target key end

     0   :  { %v2101_v2 = vmov 2   ;;  %v2102_v3 = vmov 0   ;;  %s3062_s0 = inlined_call_operand.vmem [shape: f32[4,128], index: 0, kind: input, shape index: {}]   ;;  %s3063_s1 = inlined_call_operand.vmem [shape: f32[64,4], index: 1, kind: input, shape index: {}]   ;;  %s3064_s2 = inlined_call_operand.vmem [shape: f32[64,1], index: 2, kind: input, shape index: {}]   ;;  %s3065_s3 = inlined_call_operand.vmem [shape: f32[256,64], index: 3, kind: input, shape index: {}]   ;;  %s3066_s4 = inlined_call_operand.vmem [shape: f32[256,1], index: 4, kind: input, shape index: {}]   ;;  %s3067_s5 = inlined_call_operand.vmem [shape: f32[256,256], index: 5, kind: input, shape index: {}]   ;;  %s3068_s6 = inlined_call_operand.vmem [shape: f32[256,1], index: 6, kind: input, shape index: {}]   ;;  %s3069_s7 = inlined_call_operand.vmem [shape: f32[64,256], index: 7, kind: input, shape index: {}]   ;;  %s3070_s8 = inlined_call_operand.vmem [shape: f32[64,1], index: 8, kind: input, shape index: {}]   ;;  %s3071_s9 = inlined_call_operand.vmem [shape: f32[8,64], index: 9, kind: input, shape index: {}]   ;;  %s3072_s10 = inlined_call_operand.vmem [shape: f32[8,1], index: 10, kind: input, shape index: {}]   ;;  %s3073_s11 = inlined_call_operand.hbm [shape: f32[8,128], index: 11, kind: output, shape index: {}]  }
   0x1   :  { %v48_v0 = vld [vmem:[%s3064_s2] sm:$0xff]  ;;  %v42_v1 = vld [vmem:[%s3063_s1 + $0x10] sm:$0xff]  ;;  %2060 = vset.pattern.permute.xlu0 %v2101_v2  ;;  %2052 = vset.pattern.permute.xlu1 %v2102_v3  ;;  %v49_v4 = vld [vmem:[%s3064_s2 + $0x8] sm:$0xff] }
   0x2   :  { %110 = vperm.xlu1 %2052, %v48_v0   ;;  %217 = vperm.xlu0 %2060, %v42_v1   ;;  %v40_v5 = vld [vmem:[%s3063_s1] sm:$0xff] }
   0x3   :  { %16 = vsyncpa [#allocation3], 0  ;;  %v41_v6 = vld [vmem:[%s3063_s1 + $0x8] sm:$0xff]  ;;  %v2103_v7 = vmov 1   ;;  %v43_v8 = vld [vmem:[%s3063_s1 + $0x18] sm:$0xff]  ;;  %v2104_v14 = vmov 3   ;;  %v96_v57 = vlaneseq }
   0x4   :  { %v50_v9 = vld [vmem:[%s3064_s2 + $0x10] sm:$0xff]  ;;  %v53_v10 = vld [vmem:[%s3064_s2 + $0x28] sm:$0xff]  ;;  %v2202_v11 = vld [vmem:[%s3063_s1 + $0x38] sm:$0xff]  ;;  %vm544_vm0 = vcmask 523264   ;;  %vm2106_vm1 = vmmov 0   ;;  %s2108_s12 = smov [#allocation2]  }
   0x5   :  { %v51_v12 = vld [vmem:[%s3064_s2 + $0x18] sm:$0xff]  ;;  %v54_v13 = vld [vmem:[%s3064_s2 + $0x30] sm:$0xff]  ;;  %v44_v16 = vld [vmem:[%s3063_s1 + $0x20] sm:$0xff]  ;;  %v97_v62 = vshrl.u32 %v96_v57, 7  ;;  %s1675_s13 = sshll.u32 %s2108_s12, 4  ;;  %s1676_s13 = int_to_ptr.vmem [resolvable:$true] %s1675_s13 }
   0x6   :  { %115 = vperm.xlu1 %2052, %v49_v4   ;;  %2061 = vset.pattern.permute.xlu0 %v2102_v3  ;;  %v46_v15 = vld [vmem:[%s3063_s1 + $0x30] sm:$0xff]  ;;  %v45_v17 = vld [vmem:[%s3063_s1 + $0x28] sm:$0xff]  ;;  %v52_v18 = vld [vmem:[%s3064_s2 + $0x20] sm:$0xff]  ;;  %s2077_s14 = scalar_lea.vmem %s1676_s13, 128  ;;  %p2082_p1 = scmp.lt.s32.totalorder %s1676_s13, %s1676_s13 }
   0x7   :  { %58 = vperm.xlu0 %2061, %v40_v5   ;;  %v352_v19 = vld [vmem:[%s3066_s4] sm:$0xff]  ;;  %v355_v20 = vld [vmem:[%s3066_s4 + $0x18] sm:$0xff]  ;;  %v357_v21 = vld [vmem:[%s3066_s4 + $0x28] sm:$0xff]  ;;  %p2078_p0 = scmp.ne.s32.totalorder %s1676_s13, %s2077_s14  ;;  %p2083_p2 = scmp.lt.s32.totalorder %s2077_s14, %s2077_s14 }
   0x8   :  { %v359_v22 = vld [vmem:[%s3066_s4 + $0x38] sm:$0xff]  ;;  %v361_v23 = vld [vmem:[%s3066_s4 + $0x48] sm:$0xff]  ;;  %v354_v34 = vld [vmem:[%s3066_s4 + $0x10] sm:$0xff] }
   0x9   :  { %v55_v24 = vld [vmem:[%s3064_s2 + $0x38] sm:$0xff]  ;;  %v365_v26 = vld [vmem:[%s3066_s4 + $0x68] sm:$0xff]  ;;  %v320_v36 = vld [vmem:[%s3065_s3] sm:$0xff]  ;;  %p2084_p3 = por %p2083_p2, %p2082_p1 }
   0xa   :  { %2053 = vset.pattern.permute.xlu1 %v2103_v7  ;;  %v363_v25 = vld [vmem:[%s3066_s4 + $0x58] sm:$0xff]  ;;  %v369_v28 = vld [vmem:[%s3066_s4 + $0x88] sm:$0xff]  ;;  %v356_v37 = vld [vmem:[%s3066_s4 + $0x20] sm:$0xff]  ;;  %1837 = vmatprep.mubr.msk.f32.mxu0 %vm544_vm0, %v320_v36 }
   0xb   :  { %161 = vperm.xlu1 %2053, %v41_v6   ;;  %63 = vperm.xlu0 %2061, %v41_v6   ;;  %v367_v27 = vld [vmem:[%s3066_s4 + $0x78] sm:$0xff]  ;;  %v373_v30 = vld [vmem:[%s3066_s4 + $0xa8] sm:$0xff]  ;;  %v358_v41 = vld [vmem:[%s3066_s4 + $0x30] sm:$0xff]  ;;  %p2085_p4 = pnand %p2084_p3, %p2078_p0 }
   0xc   :  { %v371_v29 = vld [vmem:[%s3066_s4 + $0x98] sm:$0xff]  ;;  %v353_v32 = vld [vmem:[%s3066_s4 + $0x8] sm:$0xff]  ;;  %v360_v45 = vld [vmem:[%s3066_s4 + $0x40] sm:$0xff] }
   0xd   :  { %v375_v31 = vld [vmem:[%s3066_s4 + $0xb8] sm:$0xff]  ;;  %v377_v33 = vld [vmem:[%s3066_s4 + $0xc8] sm:$0xff]  ;;  %v362_v49 = vld [vmem:[%s3066_s4 + $0x50] sm:$0xff] }
   0xe   :  { %v379_v35 = vld [vmem:[%s3066_s4 + $0xd8] sm:$0xff]  ;;  %v381_v38 = vld [vmem:[%s3066_s4 + $0xe8] sm:$0xff]  ;;  %v364_v52 = vld [vmem:[%s3066_s4 + $0x60] sm:$0xff] }
   0xf   :  { %2054 = vset.pattern.permute.xlu1 %v2102_v3  ;;  %73 = vperm.xlu0 %2061, %v43_v8   ;;  %v383_v42 = vld [vmem:[%s3066_s4 + $0xf8] sm:$0xff]  ;;  %v979_v46 = vld [vmem:[%s3068_s6 + $0x88] sm:$0xff]  ;;  %v366_v56 = vld [vmem:[%s3066_s4 + $0x70] sm:$0xff] }
  0x10   :  { %68 = vperm.xlu1 %2054, %v42_v1   ;;  %v963_v50 = vld [vmem:[%s3068_s6 + $0x8] sm:$0xff]  ;;  %v981_v54 = vld [vmem:[%s3068_s6 + $0x98] sm:$0xff]  ;;  %v368_v61 = vld [vmem:[%s3066_s4 + $0x80] sm:$0xff] }
  0x11   :  { %v965_v59 = vld [vmem:[%s3068_s6 + $0x18] sm:$0xff]  ;;  %v983_v0 = vld [vmem:[%s3068_s6 + $0xa8] sm:$0xff]  ;;  %v39_v4 = vld [vmem:[%s3062_s0] sm:$0xf] }
  0x12   :  { %v971_v36 = vld [vmem:[%s3068_s6 + $0x48] sm:$0xff] }
  0x13   :  { %120 = vperm.xlu0 %2061, %v50_v9  }
  0x14   :  { %2055 = vset.pattern.permute.xlu1 %v2101_v2 }
  0x15   :  { %209 = vperm.xlu1 %2055, %v40_v5  }
  0x17   :  { %135 = vperm.xlu0 %2061, %v53_v10   ;;  %v190_v10 = vsub.s32 1, %v97_v62 }
  0x19   :  { %213 = vperm.xlu1 %2055, %v41_v6  }
  0x1b   :  { %93 = vperm.xlu0 %2061, %v2202_v11  }
  0x1d   :  { %2056 = vset.pattern.permute.xlu1 %v2102_v3 }
  0x1e   :  { %125 = vperm.xlu1 %2056, %v51_v12  }
  0x1f   :  { %140 = vperm.xlu0 %2061, %v54_v13   ;;  %v374_v13 = vld [vmem:[%s3066_s4 + $0xb0] sm:$0xff] }
  0x22   :  { %2057 = vset.pattern.permute.xlu1 %v2103_v7 }
  0x23   :  { %2068 = vset.pattern.permute.xlu0 %v2103_v7  ;;  %169 = vperm.xlu1 %2057, %v43_v8  }
  0x24   :  { %157 = vperm.xlu0 %2068, %v40_v5  }
  0x27   :  { %2058 = vset.pattern.permute.xlu1 %v2104_v14 }
  0x28   :  { %165 = vperm.xlu0 %2068, %v42_v1   ;;  %261 = vperm.xlu1 %2058, %v40_v5   ;;  %v967_v5 = vld [vmem:[%s3068_s6 + $0x28] sm:$0xff] }
  0x2c   :  { %181 = vperm.xlu0 %2068, %v46_v15   ;;  %2059 = vset.pattern.permute.xlu1 %v2102_v3 }
  0x2d   :  { %78 = vperm.xlu1 %2059, %v44_v16  }
  0x30   :  { %2070 = vset.pattern.permute.xlu0 %v2104_v14 }
  0x31   :  { %265 = vperm.xlu0 %2070, %v41_v6   ;;  %83 = vperm.xlu1 %2059, %v45_v17  }
  0x35   :  { %269 = vperm.xlu0 %2070, %v42_v1   ;;  %2062 = vset.pattern.permute.xlu1 %v2101_v2 }
  0x36   :  { %221 = vperm.xlu1 %2062, %v43_v8  }
  0x39   :  { %281 = vperm.xlu0 %2070, %v45_v17  }
  0x3a   :  { %2063 = vset.pattern.permute.xlu1 %v2102_v3 }
  0x3b   :  { %130 = vperm.xlu1 %2063, %v52_v18   ;;  %v969_v18 = vld [vmem:[%s3068_s6 + $0x38] sm:$0xff] }
  0x3d   :  { %285 = vperm.xlu0 %2070, %v46_v15  }
  0x3f   :  { %2064 = vset.pattern.permute.xlu1 %v2103_v7 }
  0x40   :  { %173 = vperm.xlu1 %2064, %v44_v16  }
  0x41   :  { %2075 = vset.pattern.permute.xlu0 %v2102_v3 }
  0x42   :  { %386 = vperm.xlu0 %2075, %v352_v19  }
  0x44   :  { %177 = vperm.xlu1 %2064, %v45_v17  }
  0x46   :  { %401 = vperm.xlu0 %2075, %v355_v20   ;;  %v294_v20 = vsub.s32 3, %v97_v62 }
  0x48   :  { %2065 = vset.pattern.permute.xlu1 %v2104_v14 }
  0x49   :  { %273 = vperm.xlu1 %2065, %v43_v8   ;;  %v372_v8 = vld [vmem:[%s3066_s4 + $0xa0] sm:$0xff] }
  0x4a   :  { %411 = vperm.xlu0 %2075, %v357_v21   ;;  %v376_v21 = vld [vmem:[%s3066_s4 + $0xc0] sm:$0xff] }
  0x4d   :  { %2066 = vset.pattern.permute.xlu1 %v2102_v3 }
  0x4e   :  { %88 = vperm.xlu1 %2066, %v46_v15   ;;  %421 = vperm.xlu0 %2075, %v359_v22  }
  0x52   :  { %2067 = vset.pattern.permute.xlu1 %v2101_v2  ;;  %431 = vperm.xlu0 %2075, %v361_v23  }
  0x53   :  { %225 = vperm.xlu1 %2067, %v44_v16  }
  0x56   :  { %441 = vperm.xlu0 %2075, %v363_v25  }
  0x57   :  { %229 = vperm.xlu1 %2067, %v45_v17  }
  0x5a   :  { %451 = vperm.xlu0 %2075, %v365_v26  }
  0x5b   :  { %2069 = vset.pattern.permute.xlu1 %v2102_v3 }
  0x5c   :  { %145 = vperm.xlu1 %2069, %v55_v24  }
  0x5e   :  { %461 = vperm.xlu0 %2075, %v367_v27   ;;  %v987_v27 = vld [vmem:[%s3068_s6 + $0xc8] sm:$0xff] }
  0x60   :  { %2071 = vset.pattern.permute.xlu1 %v2103_v7 }
  0x61   :  { %185 = vperm.xlu1 %2071, %v2202_v11  }
  0x62   :  { %471 = vperm.xlu0 %2075, %v369_v28  }
  0x65   :  { %2072 = vset.pattern.permute.xlu1 %v2104_v14 }
  0x66   :  { %277 = vperm.xlu1 %2072, %v44_v16   ;;  %481 = vperm.xlu0 %2075, %v371_v29   ;;  %v2387_v16 = vrot.slane %v39_v4, %v190_v10  ;;  %v2403_v29 = vrot.slane %v39_v4, %v294_v20 }
  0x6a   :  { %2073 = vset.pattern.permute.xlu1 %v2101_v2  ;;  %491 = vperm.xlu0 %2075, %v373_v30   ;;  %v370_v2 = vld [vmem:[%s3066_s4 + $0x90] sm:$0xff] }
  0x6b   :  { %233 = vperm.xlu1 %2073, %v46_v15   ;;  %v378_v30 = vld [vmem:[%s3066_s4 + $0xd0] sm:$0xff] }
  0x6e   :  { %501 = vperm.xlu0 %2075, %v375_v31  }
  0x6f   :  { %237 = vperm.xlu1 %2073, %v2202_v11  }
  0x72   :  { %511 = vperm.xlu0 %2075, %v377_v33  }
  0x73   :  { %2074 = vset.pattern.permute.xlu1 %v2104_v14  ;;  %v242_v14 = vsub.s32 2, %v97_v62 }
  0x74   :  { %289 = vperm.xlu1 %2074, %v2202_v11   ;;  %v985_v11 = vld [vmem:[%s3068_s6 + $0xb8] sm:$0xff] }
  0x75   :  { %v2396_v22 = vrot.slane %v39_v4, %v242_v14 }
  0x76   :  { %521 = vperm.xlu0 %2075, %v379_v35  }
  0x78   :  { %2076 = vset.pattern.permute.xlu1 %v2102_v3  ;;  %v98_v3 = vsub.s32 0, %v97_v62 }
  0x79   :  { %391 = vperm.xlu1 %2076, %v353_v32  }
  0x7a   :  { %531 = vperm.xlu0 %2075, %v381_v38   ;;  %v2376_v9 = vrot.slane %v39_v4, %v98_v3  ;;  %v980_v3 = vld [vmem:[%s3068_s6 + $0x90] sm:$0xff] }
  0x7d   :  { %396 = vperm.xlu1 %2076, %v354_v34  }
  0x7e   :  { %541 = vperm.xlu0 %2075, %v383_v42  }
  0x81   :  { %v2306_v39 = vpop.permute.xlu1 %110  ;;  %v2308_v40 = vpop.permute.xlu0 %217  ;;  %406 = vperm.xlu1 %2076, %v356_v37  }
  0x82   :  { %1081 = vperm.xlu0 %2075, %v979_v46   ;;  %v246_v14 = vmul.f32 %v2396_v22, %v2308_v40  ;;  %v982_v40 = vld [vmem:[%s3068_s6 + $0xa0] sm:$0xff] }
  0x85   :  { %v2316_v43 = vpop.permute.xlu1 %115  ;;  %416 = vperm.xlu1 %2076, %v358_v41   ;;  %v380_v41 = vld [vmem:[%s3066_s4 + $0xe0] sm:$0xff] }
  0x86   :  { %v59_v44 = vpop.permute.xlu0 %58  ;;  %1001 = vperm.xlu0 %2075, %v963_v50  }
  0x87   :  { %v100_v15 = vmul.f32 %v2376_v9, %v59_v44 }
  0x89   :  { %426 = vperm.xlu1 %2076, %v360_v45   ;;  %v148_v23 = vadd.f32 %v2306_v39, %v100_v15  ;;  %v989_v45 = vld [vmem:[%s3068_s6 + $0xd8] sm:$0xff] }
  0x8a   :  { %v2324_v47 = vpop.permute.xlu1 %161  ;;  %v64_v48 = vpop.permute.xlu0 %63  ;;  %1091 = vperm.xlu0 %2075, %v981_v54  }
  0x8b   :  { %v101_v24 = vmul.f32 %v2376_v9, %v64_v48  ;;  %v193_v34 = vmul.f32 %v2387_v16, %v2324_v47 }
  0x8d   :  { %436 = vperm.xlu1 %2076, %v362_v49   ;;  %v149_v31 = vadd.f32 %v2316_v43, %v101_v24  ;;  %v382_v49 = vld [vmem:[%s3066_s4 + $0xf0] sm:$0xff] }
  0x8e   :  { %v2332_v51 = vpop.permute.xlu0 %73  ;;  %1011 = vperm.xlu0 %2075, %v965_v59  }
  0x8f   :  { %v2337_v53 = vpop.permute.xlu1 %68  ;;  %v201_v42 = vadd.f32 %v193_v34, %v149_v31  ;;  %v103_v10 = vmul.f32 %v2376_v9, %v2332_v51  ;;  %v977_v51 = vld [vmem:[%s3068_s6 + $0x78] sm:$0xff] }
  0x91   :  { %446 = vperm.xlu1 %2076, %v364_v52   ;;  %v973_v52 = vld [vmem:[%s3068_s6 + $0x58] sm:$0xff] }
  0x92   :  { %v2342_v55 = vpop.permute.xlu0 %120  ;;  %1101 = vperm.xlu0 %2075, %v983_v0   ;;  %v975_v0 = vld [vmem:[%s3068_s6 + $0x68] sm:$0xff] }
  0x94   :  { %v210_v58 = vpop.permute.xlu1 %209 }
  0x95   :  { %456 = vperm.xlu1 %2076, %v366_v56   ;;  %v244_v32 = vmul.f32 %v2396_v22, %v210_v58  ;;  %v978_v58 = vld [vmem:[%s3068_s6 + $0x80] sm:$0xff] }
  0x96   :  { %v2350_v60 = vpop.permute.xlu0 %135  ;;  %1021 = vperm.xlu0 %2075, %v967_v5  }
  0x98   :  { %v214_v63 = vpop.permute.xlu1 %213 }
  0x99   :  { %466 = vperm.xlu1 %2076, %v368_v61   ;;  %v245_v37 = vmul.f32 %v2396_v22, %v214_v63  ;;  %v991_v61 = vld [vmem:[%s3068_s6 + $0xe8] sm:$0xff]  ;;  %v962_v63 = vld [vmem:[%s3068_s6] sm:$0xff] }
  0x9a   :  { %v2358_v1 = vpop.permute.xlu0 %93  ;;  %1111 = vperm.xlu0 %2075, %v985_v11  }
  0x9b   :  { %v253_v46 = vadd.f32 %v245_v37, %v201_v42 }
  0x9d   :  { %v2369_v6 = vpop.permute.xlu1 %125  ;;  %476 = vperm.xlu1 %2076, %v370_v2   ;;  %v102_v2 = vmul.f32 %v2376_v9, %v2337_v53 }
  0x9e   :  { %v2371_v7 = vpop.permute.xlu0 %140  ;;  %1031 = vperm.xlu0 %2075, %v969_v18  }
  0x9f   :  { %v150_v11 = vadd.f32 %v2342_v55, %v102_v2  ;;  %v151_v55 = vadd.f32 %v2369_v6, %v103_v10 }
  0xa1   :  { %486 = vperm.xlu1 %2076, %v372_v8   ;;  %v993_v8 = vld [vmem:[%s3068_s6 + $0xf8] sm:$0xff] }
  0xa2   :  { %v2381_v12 = vpop.permute.xlu1 %169  ;;  %1121 = vperm.xlu0 %2075, %v987_v27   ;;  %v966_v27 = vld [vmem:[%s3068_s6 + $0x20] sm:$0xff] }
  0xa3   :  { %v158_v17 = vpop.permute.xlu0 %157  ;;  %v195_v15 = vmul.f32 %v2387_v16, %v2381_v12 }
  0xa4   :  { %v192_v19 = vmul.f32 %v2387_v16, %v158_v17 }
  0xa5   :  { %496 = vperm.xlu1 %2076, %v374_v13   ;;  %v964_v13 = vld [vmem:[%s3068_s6 + $0x10] sm:$0xff] }
  0xa6   :  { %v200_v28 = vadd.f32 %v192_v19, %v148_v23  ;;  %1041 = vperm.xlu0 %2075, %v971_v36   ;;  %v1428_v23 = vld [vmem:[%s3070_s8 + $0x8] sm:$0xff] }
  0xa7   :  { %v166_v25 = vpop.permute.xlu0 %165  ;;  %v262_v26 = vpop.permute.xlu1 %261 }
  0xa8   :  { %v252_v38 = vadd.f32 %v244_v32, %v200_v28  ;;  %v296_v39 = vmul.f32 %v2403_v29, %v262_v26  ;;  %v194_v4 = vmul.f32 %v2387_v16, %v166_v25 }
  0xa9   :  { %506 = vperm.xlu1 %2076, %v376_v21   ;;  %v203_v21 = vadd.f32 %v195_v15, %v151_v55  ;;  %v107_v55 = vmul.f32 %v2376_v9, %v2358_v1  ;;  %v976_v1 = vld [vmem:[%s3068_s6 + $0x70] sm:$0xff] }
  0xaa   :  { %v304_v47 = vadd.f32 %v296_v39, %v252_v38  ;;  %1131 = vperm.xlu0 %2075, %v989_v45   ;;  %v202_v17 = vadd.f32 %v194_v4, %v150_v11  ;;  %v984_v38 = vld [vmem:[%s3068_s6 + $0xb0] sm:$0xff] }
  0xab   :  { %v2410_v33 = vpop.permute.xlu0 %181  ;;  %v972_v4 = vld [vmem:[%s3068_s6 + $0x50] sm:$0xff] }
  0xac   :  { %v2414_v35 = vpop.permute.xlu1 %78  ;;  %v312_v57 = vmax.f32 %v304_v47, 0.0  ;;  %v254_v12 = vadd.f32 %v246_v14, %v202_v17  ;;  %v198_v36 = vmul.f32 %v2387_v16, %v2410_v33  ;;  %v968_v33 = vld [vmem:[%s3068_s6 + $0x30] sm:$0xff]  ;;  %v974_v17 = vld [vmem:[%s3068_s6 + $0x60] sm:$0xff] }
  0xad   :  { %516 = vperm.xlu1 %2076, %v378_v30   ;;  %v1430_v30 = vld [vmem:[%s3070_s8 + $0x18] sm:$0xff] }
  0xae   :  { %1051 = vperm.xlu0 %2075, %v973_v52  }
  0xb0   :  { %v266_v43 = vpop.permute.xlu0 %265  ;;  %v2424_v44 = vpop.permute.xlu1 %83 }
  0xb1   :  { %v297_v48 = vmul.f32 %v2403_v29, %v266_v43  ;;  %526 = vperm.xlu1 %2076, %v380_v41   ;;  %v1432_v41 = vld [vmem:[%s3070_s8 + $0x28] sm:$0xff] }
  0xb2   :  { %1141 = vperm.xlu0 %2075, %v991_v61  }
  0xb3   :  { %v305_v50 = vadd.f32 %v297_v48, %v253_v46  ;;  %v1434_v46 = vld [vmem:[%s3070_s8 + $0x38] sm:$0xff]  ;;  %v105_v48 = vmul.f32 %v2376_v9, %v2424_v44  ;;  %v104_v44 = vmul.f32 %v2376_v9, %v2414_v35 }
  0xb4   :  { %v270_v53 = vpop.permute.xlu0 %269 }
  0xb5   :  { %v313_v54 = vmax.f32 %v305_v50, 0.0  ;;  %v222_v56 = vpop.permute.xlu1 %221  ;;  %536 = vperm.xlu1 %2076, %v382_v49   ;;  %v298_v19 = vmul.f32 %v2403_v29, %v270_v53  ;;  %v970_v49 = vld [vmem:[%s3068_s6 + $0x40] sm:$0xff] }
  0xb6   :  { %1061 = vperm.xlu0 %2075, %v975_v0   ;;  %v247_v20 = vmul.f32 %v2396_v22, %v222_v56 }
  0xb7   :  { %v1904_v59 = vpack.c.bf16 %v313_v54, %v312_v57  ;;  %v306_v25 = vadd.f32 %v298_v19, %v254_v12  ;;  %v153_v54 = vadd.f32 %v2350_v60, %v105_v48  ;;  %v988_v57 = vld [vmem:[%s3068_s6 + $0xd0] sm:$0xff]  ;;  %v331_v48 = vld [vmem:[%s3065_s3 + $0x58] sm:$0xff] }
  0xb8   :  { %v255_v26 = vadd.f32 %v247_v20, %v203_v21 }
  0xb9   :  { %1905 = vmatprep.subr.bf16.mxu0 %v1904_v59  ;;  %1076 = vperm.xlu1 %2076, %v978_v58   ;;  %v314_v31 = vmax.f32 %v306_v25, 0.0  ;;  %v282_v58 = vpop.permute.xlu0 %281 }
  0xba   :  { %v2442_v62 = vpop.permute.xlu1 %130  ;;  %1907 = vmatpush3.bf16.msra.mxu0 %v1904_v59  ;;  %1151 = vperm.xlu0 %2075, %v993_v8  }
  0xbb   :  { %v152_v0 = vadd.f32 %v2442_v62, %v104_v44  ;;  %v990_v62 = vld [vmem:[%s3068_s6 + $0xe0] sm:$0xff]  ;;  %v339_v44 = vld [vmem:[%s3065_s3 + $0x98] sm:$0xff] }
  0xbd   :  { %996 = vperm.xlu1 %2076, %v962_v63   ;;  %v286_v21 = vpop.permute.xlu0 %285 }
  0xbe   :  { %1071 = vperm.xlu0 %2075, %v977_v51  }
  0xbf   :  { %v2456_v5 = vpop.permute.xlu1 %173 }
  0xc0   :  { %v196_v59 = vmul.f32 %v2387_v16, %v2456_v5 }
  0xc1   :  { %1086 = vperm.xlu1 %2076, %v980_v3   ;;  %v301_v3 = vmul.f32 %v2403_v29, %v282_v58  ;;  %v338_v58 = vld [vmem:[%s3065_s3 + $0x90] sm:$0xff] }
  0xc2   :  { %1442 = vperm.xlu0 %2075, %v1428_v23   ;;  %v204_v8 = vadd.f32 %v196_v59, %v152_v0  ;;  %v340_v59 = vld [vmem:[%s3065_s3 + $0xa0] sm:$0xff]  ;;  %v343_v0 = vld [vmem:[%s3065_s3 + $0xb8] sm:$0xff] }
  0xc3   :  { %v178_v18 = vpop.permute.xlu1 %177 }
  0xc4   :  { %v197_v52 = vmul.f32 %v2387_v16, %v178_v18 }
  0xc5   :  { %1006 = vperm.xlu1 %2076, %v964_v13  }
  0xc6   :  { %1452 = vperm.xlu0 %2075, %v1430_v30   ;;  %v205_v61 = vadd.f32 %v197_v52, %v153_v54  ;;  %v1427_v30 = vld [vmem:[%s3070_s8] sm:$0xff]  ;;  %v334_v52 = vld [vmem:[%s3065_s3 + $0x70] sm:$0xff]  ;;  %v335_v54 = vld [vmem:[%s3065_s3 + $0x78] sm:$0xff] }
  0xc8   :  { %v274_v24 = vpop.permute.xlu1 %273 }
  0xc9   :  { %v299_v6 = vmul.f32 %v2403_v29, %v274_v24  ;;  %1096 = vperm.xlu1 %2076, %v982_v40   ;;  %v992_v40 = vld [vmem:[%s3068_s6 + $0xf0] sm:$0xff] }
  0xca   :  { %1462 = vperm.xlu0 %2075, %v1432_v41   ;;  %v1433_v41 = vld [vmem:[%s3070_s8 + $0x30] sm:$0xff] }
  0xcb   :  { %v307_v28 = vadd.f32 %v299_v6, %v255_v26  ;;  %v302_v26 = vmul.f32 %v2403_v29, %v286_v21 }
  0xcd   :  { %v315_v32 = vmax.f32 %v307_v28, 0.0  ;;  %v89_v34 = vpop.permute.xlu1 %88  ;;  %1016 = vperm.xlu1 %2076, %v966_v27  }
  0xce   :  { %v106_v37 = vmul.f32 %v2376_v9, %v89_v34  ;;  %1472 = vperm.xlu0 %2075, %v1434_v46   ;;  %v1429_v34 = vld [vmem:[%s3070_s8 + $0x10] sm:$0xff]  ;;  %v328_v46 = vld [vmem:[%s3065_s3 + $0x40] sm:$0xff] }
  0xcf   :  { %v1908_v39 = vpack.c.bf16 %v315_v32, %v314_v31 }
  0xd0   :  { %v154_v42 = vadd.f32 %v2371_v7, %v106_v37  ;;  %v986_v7 = vld [vmem:[%s3068_s6 + $0xc0] sm:$0xff] }
  0xd1   :  { %1909 = vmatprep.subr.bf16.mxu0 %v1908_v39  ;;  %1106 = vperm.xlu1 %2076, %v984_v38   ;;  %v1431_v37 = vld [vmem:[%s3070_s8 + $0x20] sm:$0xff]  ;;  %v323_v38 = vld [vmem:[%s3065_s3 + $0x18] sm:$0xff] }
  0xd2   :  { %v226_v43 = vpop.permute.xlu1 %225  ;;  %1911 = vmatpush3.bf16.msra.mxu0 %v1908_v39  ;;  %v206_v45 = vadd.f32 %v198_v36, %v154_v42  ;;  %v322_v36 = vld [vmem:[%s3065_s3 + $0x10] sm:$0xff]  ;;  %v324_v39 = vld [vmem:[%s3065_s3 + $0x20] sm:$0xff]  ;;  %v325_v42 = vld [vmem:[%s3065_s3 + $0x28] sm:$0xff] }
  0xd3   :  { %v248_v60 = vmul.f32 %v2396_v22, %v226_v43  ;;  %v326_v43 = vld [vmem:[%s3065_s3 + $0x30] sm:$0xff] }
  0xd5   :  { %1026 = vperm.xlu1 %2076, %v968_v33   ;;  %v256_v35 = vadd.f32 %v248_v60, %v204_v8  ;;  %v327_v33 = vld [vmem:[%s3065_s3 + $0x38] sm:$0xff]  ;;  %v344_v60 = vld [vmem:[%s3065_s3 + $0xc0] sm:$0xff] }
  0xd6   :  { %v230_v47 = vpop.permute.xlu1 %229  ;;  %v348_v8 = vld [vmem:[%s3065_s3 + $0xe0] sm:$0xff] }
  0xd7   :  { %v249_v56 = vmul.f32 %v2396_v22, %v230_v47  ;;  %v329_v47 = vld [vmem:[%s3065_s3 + $0x48] sm:$0xff] }
  0xd9   :  { %1116 = vperm.xlu1 %2076, %v986_v7   ;;  %v257_v2 = vadd.f32 %v249_v56, %v205_v61  ;;  %v330_v7 = vld [vmem:[%s3065_s3 + $0x50] sm:$0xff]  ;;  %v336_v56 = vld [vmem:[%s3065_s3 + $0x80] sm:$0xff]  ;;  %v341_v61 = vld [vmem:[%s3065_s3 + $0xa8] sm:$0xff] }
  0xdb   :  { %v146_v50 = vpop.permute.xlu1 %145  ;;  %v309_v11 = vadd.f32 %v301_v3, %v257_v2  ;;  %v345_v2 = vld [vmem:[%s3065_s3 + $0xc8] sm:$0xff]  ;;  %v346_v3 = vld [vmem:[%s3065_s3 + $0xd0] sm:$0xff] }
  0xdc   :  { %v155_v12 = vadd.f32 %v146_v50, %v107_v55  ;;  %v333_v50 = vld [vmem:[%s3065_s3 + $0x68] sm:$0xff] }
  0xdd   :  { %1036 = vperm.xlu1 %2076, %v970_v49   ;;  %v317_v13 = vmax.f32 %v309_v11, 0.0  ;;  %v332_v49 = vld [vmem:[%s3065_s3 + $0x60] sm:$0xff]  ;;  %v351_v11 = vld [vmem:[%s3065_s3 + $0xf8] sm:$0xff] }
  0xe0   :  { %v186_v63 = vpop.permute.xlu1 %185 }
  0xe1   :  { %1126 = vperm.xlu1 %2076, %v988_v57   ;;  %v199_v19 = vmul.f32 %v2387_v16, %v186_v63  ;;  %v337_v57 = vld [vmem:[%s3065_s3 + $0x88] sm:$0xff]  ;;  %v342_v63 = vld [vmem:[%s3065_s3 + $0xb0] sm:$0xff] }
  0xe3   :  { %v207_v25 = vadd.f32 %v199_v19, %v155_v12 }
  0xe5   :  { %v278_v10 = vpop.permute.xlu1 %277  ;;  %1046 = vperm.xlu1 %2076, %v972_v4   ;;  %v347_v4 = vld [vmem:[%s3065_s3 + $0xd8] sm:$0xff] }
  0xe6   :  { %v300_v5 = vmul.f32 %v2403_v29, %v278_v10  ;;  %v349_v10 = vld [vmem:[%s3065_s3 + $0xe8] sm:$0xff] }
  0xe8   :  { %v308_v53 = vadd.f32 %v300_v5, %v256_v35  ;;  %v350_v35 = vld [vmem:[%s3065_s3 + $0xf0] sm:$0xff]  ;;  %v2105_v5 = vmov 0.0|0.0  }
  0xe9   :  { %1136 = vperm.xlu1 %2076, %v990_v62   ;;  %2012 = vmatprep.subr.bf16.mxu1 %v2105_v5  ;;  %v899_v62 = vld [vmem:[%s3067_s5 + $0x8] sm:$0xff] }
  0xea   :  { %v316_v14 = vmax.f32 %v308_v53, 0.0  ;;  %v234_v15 = vpop.permute.xlu1 %233  ;;  %v917_v53 = vld [vmem:[%s3067_s5 + $0x98] sm:$0xff] }
  0xeb   :  { %v250_v18 = vmul.f32 %v2396_v22, %v234_v15  ;;  %1263 = vmatprep.mubr.f32.mxu1 %v917_v53 }
  0xec   :  { %v1912_v51 = vpack.c.bf16 %v317_v13, %v316_v14  ;;  %v387_v13 = vpop.permute.xlu0 %386 }
  0xed   :  { %1056 = vperm.xlu1 %2076, %v974_v17   ;;  %v258_v23 = vadd.f32 %v250_v18, %v206_v45  ;;  %v1589_v45 = vld [vmem:[%s3072_s10] sm:$0xff] }
  0xee   :  { %v238_v20 = vpop.permute.xlu1 %237  ;;  %1913 = vmatprep.subr.bf16.mxu0 %v1912_v51 }
  0xef   :  { %1915 = vmatpush3.bf16.msra.mxu0 %v1912_v51  ;;  %v251_v24 = vmul.f32 %v2396_v22, %v238_v20  ;;  %v310_v16 = vadd.f32 %v302_v26, %v258_v23 }
  0xf0   :  { %v402_v15 = vpop.permute.xlu0 %401 }
  0xf1   :  { %1146 = vperm.xlu1 %2076, %v992_v40   ;;  %v259_v6 = vadd.f32 %v251_v24, %v207_v25  ;;  %v318_v22 = vmax.f32 %v310_v16, 0.0 }
  0xf3   :  { %v290_v9 = vpop.permute.xlu1 %289 }
  0xf4   :  { %v303_v27 = vmul.f32 %v2403_v29, %v290_v9  ;;  %v321_v29 = vld [vmem:[%s3065_s3 + $0x8] sm:$0xff]  ;;  %v412_v18 = vpop.permute.xlu0 %411 }
  0xf5   :  { %1066 = vperm.xlu1 %2076, %v976_v1  }
  0xf6   :  { %v311_v28 = vadd.f32 %v303_v27, %v259_v6 }
  0xf8   :  { %v319_v31 = vmax.f32 %v311_v28, 0.0  ;;  %v392_v14 = vpop.permute.xlu1 %391  ;;  %v422_v55 = vpop.permute.xlu0 %421 }
  0xf9   :  { %1437 = vperm.xlu1 %2076, %v1427_v30  }
  0xfa   :  { %v1916_v32 = vpack.c.bf16 %v319_v31, %v318_v22 }
  0xfc   :  { %1917 = vmatprep.subr.bf16.mxu0 %v1916_v32  ;;  %v397_v17 = vpop.permute.xlu1 %396  ;;  %v432_v20 = vpop.permute.xlu0 %431 }
  0xfd   :  { %1919 = vmatpush3.bf16.msra.mxu0 %v1916_v32  ;;  %1447 = vperm.xlu1 %2076, %v1429_v34  }
  0xfe   :  { %1920 = vmatprep.subr.bf16.mxu0 %v2105_v5 }
 0x100   :  { %1838 = vmatmul.mubr.msk.f32.vlgmr.msra.gmra.mrb[0].mxu0 %vm544_vm0, %v321_v29  ;;  %v407_v51 = vpop.permute.xlu1 %406  ;;  %v442_v21 = vpop.permute.xlu0 %441 }
 0x101   :  { %1840 = vmatprep.mubr.msk.f32.mxu0 %vm544_vm0, %v322_v36  ;;  %1457 = vperm.xlu1 %2076, %v1431_v37  }
 0x104   :  { %1841 = vmatmul.mubr.msk.f32.gmra.mrb[2].mxu0 %vm544_vm0, %v323_v38  ;;  %v417_v19 = vpop.permute.xlu1 %416  ;;  %v452_v28 = vpop.permute.xlu0 %451 }
 0x105   :  { %1843 = vmatprep.mubr.msk.f32.mxu0 %vm544_vm0, %v324_v39  ;;  %1467 = vperm.xlu1 %2076, %v1433_v41  }
 0x108   :  { %1844 = vmatmul.mubr.msk.f32.gmra.mrb[4].mxu0 %vm544_vm0, %v325_v42  ;;  %v427_v40 = vpop.permute.xlu1 %426  ;;  %v462_v42 = vpop.permute.xlu0 %461 }
 0x109   :  { %1846 = vmatprep.mubr.msk.f32.mxu0 %vm544_vm0, %v326_v43  ;;  %1592 = vperm.xlu1 %2076, %v1589_v45  }
 0x10c   :  { %1847 = vmatmul.mubr.msk.f32.gmra.mrb[6].mxu0 %vm544_vm0, %v327_v33  ;;  %v437_v23 = vpop.permute.xlu1 %436 }
 0x10d   :  { %1849 = vmatprep.mubr.msk.f32.mxu0 %vm544_vm0, %v328_v46 }
 0x110   :  { %1850 = vmatmul.mubr.msk.f32.gmra.mrb[8].mxu0 %vm544_vm0, %v329_v47  ;;  %v447_v31 = vpop.permute.xlu1 %446 }
 0x111   :  { %1852 = vmatprep.mubr.msk.f32.mxu0 %vm544_vm0, %v330_v7 }
 0x114   :  { %1853 = vmatmul.mubr.msk.f32.gmra.mrb[10].mxu0 %vm544_vm0, %v331_v48  ;;  %v457_v33 = vpop.permute.xlu1 %456 }
 0x115   :  { %1855 = vmatprep.mubr.msk.f32.mxu0 %vm544_vm0, %v332_v49 }
 0x118   :  { %1856 = vmatmul.mubr.msk.f32.gmra.mrb[12].mxu0 %vm544_vm0, %v333_v50 }
 0x119   :  { %1858 = vmatprep.mubr.msk.f32.mxu0 %vm544_vm0, %v334_v52 }
 0x11c   :  { %1859 = vmatmul.mubr.msk.f32.gmra.mrb[14].mxu0 %vm544_vm0, %v335_v54 }
 0x11d   :  { %1861 = vmatprep.mubr.msk.f32.mxu0 %vm544_vm0, %v336_v56 }
 0x120   :  { %1862 = vmatmul.mubr.msk.f32.gmra.mrb[16].mxu0 %vm544_vm0, %v337_v57  ;;  %v472_v57 = vpop.permute.xlu0 %471 }
 0x121   :  { %1864 = vmatprep.mubr.msk.f32.mxu0 %vm544_vm0, %v338_v58 }
 0x124   :  { %1865 = vmatmul.mubr.msk.f32.gmra.mrb[18].mxu0 %vm544_vm0, %v339_v44 }
 0x125   :  { %1867 = vmatprep.mubr.msk.f32.mxu0 %vm544_vm0, %v340_v59  ;;  %v467_v59 = vpop.permute.xlu1 %466 }
 0x128   :  { %1868 = vmatmul.mubr.msk.f32.gmra.mrb[20].mxu0 %vm544_vm0, %v341_v61 }
 0x129   :  { %1870 = vmatprep.mubr.msk.f32.mxu0 %vm544_vm0, %v342_v63 }
 0x12c   :  { %1871 = vmatmul.mubr.msk.f32.gmra.mrb[22].mxu0 %vm544_vm0, %v343_v0 }
 0x12d   :  { %1873 = vmatprep.mubr.msk.f32.mxu0 %vm544_vm0, %v344_v60 }
 0x130   :  { %1874 = vmatmul.mubr.msk.f32.gmra.mrb[24].mxu0 %vm544_vm0, %v345_v2 }
 0x131   :  { %1876 = vmatprep.mubr.msk.f32.mxu0 %vm544_vm0, %v346_v3 }
 0x134   :  { %1877 = vmatmul.mubr.msk.f32.gmra.mrb[26].mxu0 %vm544_vm0, %v347_v4 }
 0x135   :  { %1879 = vmatprep.mubr.msk.f32.mxu0 %vm544_vm0, %v348_v8 }
 0x138   :  { %1880 = vmatmul.mubr.msk.f32.gmra.mrb[28].mxu0 %vm544_vm0, %v349_v10  ;;  %v482_v10 = vpop.permute.xlu0 %481 }
 0x139   :  { %1882 = vmatprep.mubr.msk.f32.mxu0 %vm544_vm0, %v350_v35 }
 0x13c   :  { %1883 = vmatmul.mubr.msk.f32.gmra.mrb[30].mxu0 %vm544_vm0, %v351_v11 }
 0x13d   :  { %1218 = vmatprep.mubr.f32.mxu0 %v899_v62  ;;  %v477_v62 = vpop.permute.xlu1 %476 }
 0x1d3   :  { %v1839_v12 = vpop.f32.mrb[0].mxu0 }
 0x1d4   :  { %v713_v24 = vadd.f32 %v1839_v12, %v392_v14  ;;  %v707_v25 = vpop.f32.mrb[1].mxu0  ;;  %v487_v12 = vpop.permute.xlu1 %486 }
 0x1d5   :  { %v708_v26 = vadd.f32 %v707_v25, %v387_v13 }
 0x1d6   :  { %v867_v1 = vmax.f32 %v713_v24, 0.0 }
 0x1d7   :  { %v866_v9 = vmax.f32 %v708_v26, 0.0  ;;  %v1842_v16 = vpop.f32.mrb[2].mxu0 }
 0x1d8   :  { %v723_v6 = vadd.f32 %v1842_v16, %v402_v15  ;;  %v717_v27 = vpop.f32.mrb[3].mxu0 }
 0x1d9   :  { %v1921_v30 = vpack.c.bf16 %v867_v1, %v866_v9  ;;  %v718_v22 = vadd.f32 %v717_v27, %v397_v17 }
 0x1da   :  { %v869_v32 = vmax.f32 %v723_v6, 0.0 }
 0x1db   :  { %v868_v34 = vmax.f32 %v718_v22, 0.0  ;;  %v1845_v29 = vpop.f32.mrb[4].mxu0  ;;  %1922 = vmatpush1.bf16.msra.mxu0 %v1921_v30  ;;  %2028 = vmatpush1.bf16.msra.mxu1 %v1921_v30  ;;  %v497_v22 = vpop.permute.xlu1 %496 }
 0x1dc   :  { %v733_v36 = vadd.f32 %v1845_v29, %v412_v18  ;;  %v727_v37 = vpop.f32.mrb[5].mxu0  ;;  %1923 = vmatprep.subr.bf16.mxu0 %v2105_v5  ;;  %2013 = vmatprep.subr.bf16.mxu1 %v2105_v5 }
 0x1dd   :  { %v1924_v38 = vpack.c.bf16 %v869_v32, %v868_v34  ;;  %v728_v39 = vadd.f32 %v727_v37, %v407_v51 }
 0x1de   :  { %v871_v41 = vmax.f32 %v733_v36, 0.0 }
 0x1df   :  { %v870_v43 = vmax.f32 %v728_v39, 0.0  ;;  %v1848_v45 = vpop.f32.mrb[6].mxu0  ;;  %1925 = vmatpush1.bf16.msra.mxu0 %v1924_v38  ;;  %2029 = vmatpush1.bf16.msra.mxu1 %v1924_v38 }
 0x1e0   :  { %v743_v46 = vadd.f32 %v1848_v45, %v422_v55  ;;  %v737_v47 = vpop.f32.mrb[7].mxu0  ;;  %1926 = vmatprep.subr.bf16.mxu0 %v2105_v5  ;;  %2014 = vmatprep.subr.bf16.mxu1 %v2105_v5 }
 0x1e1   :  { %v1927_v7 = vpack.c.bf16 %v871_v41, %v870_v43  ;;  %v738_v48 = vadd.f32 %v737_v47, %v417_v19 }
 0x1e2   :  { %v873_v49 = vmax.f32 %v743_v46, 0.0 }
 0x1e3   :  { %v872_v50 = vmax.f32 %v738_v48, 0.0  ;;  %v1851_v52 = vpop.f32.mrb[8].mxu0  ;;  %1928 = vmatpush1.bf16.msra.mxu0 %v1927_v7  ;;  %2030 = vmatpush1.bf16.msra.mxu1 %v1927_v7 }
 0x1e4   :  { %v753_v54 = vadd.f32 %v1851_v52, %v432_v20  ;;  %v747_v56 = vpop.f32.mrb[9].mxu0  ;;  %1929 = vmatprep.subr.bf16.mxu0 %v2105_v5  ;;  %2015 = vmatprep.subr.bf16.mxu1 %v2105_v5  ;;  %v492_v20 = vpop.permute.xlu0 %491 }
 0x1e5   :  { %v1930_v58 = vpack.c.bf16 %v873_v49, %v872_v50  ;;  %v748_v44 = vadd.f32 %v747_v56, %v427_v40 }
 0x1e6   :  { %v875_v61 = vmax.f32 %v753_v54, 0.0 }
 0x1e7   :  { %v874_v63 = vmax.f32 %v748_v44, 0.0  ;;  %v1854_v0 = vpop.f32.mrb[10].mxu0  ;;  %1931 = vmatpush1.bf16.msra.mxu0 %v1930_v58  ;;  %2031 = vmatpush1.bf16.msra.mxu1 %v1930_v58 }
 0x1e8   :  { %v763_v60 = vadd.f32 %v1854_v0, %v442_v21  ;;  %v757_v2 = vpop.f32.mrb[11].mxu0  ;;  %1932 = vmatprep.subr.bf16.mxu0 %v2105_v5  ;;  %2016 = vmatprep.subr.bf16.mxu1 %v2105_v5  ;;  %v502_v27 = vpop.permute.xlu0 %501 }
 0x1e9   :  { %v1933_v3 = vpack.c.bf16 %v875_v61, %v874_v63  ;;  %v758_v4 = vadd.f32 %v757_v2, %v437_v23 }
 0x1ea   :  { %v877_v8 = vmax.f32 %v763_v60, 0.0 }
 0x1eb   :  { %v876_v35 = vmax.f32 %v758_v4, 0.0  ;;  %v1857_v11 = vpop.f32.mrb[12].mxu0  ;;  %1934 = vmatpush1.bf16.msra.mxu0 %v1933_v3  ;;  %2032 = vmatpush1.bf16.msra.mxu1 %v1933_v3 }
 0x1ec   :  { %v773_v53 = vadd.f32 %v1857_v11, %v452_v28  ;;  %v767_v13 = vpop.f32.mrb[13].mxu0  ;;  %1935 = vmatprep.subr.bf16.mxu0 %v2105_v5  ;;  %2017 = vmatprep.subr.bf16.mxu1 %v2105_v5 }
 0x1ed   :  { %v1936_v14 = vpack.c.bf16 %v877_v8, %v876_v35  ;;  %v768_v15 = vadd.f32 %v767_v13, %v447_v31 }
 0x1ee   :  { %v879_v17 = vmax.f32 %v773_v53, 0.0 }
 0x1ef   :  { %v878_v18 = vmax.f32 %v768_v15, 0.0  ;;  %v1860_v51 = vpop.f32.mrb[14].mxu0  ;;  %1937 = vmatpush1.bf16.msra.mxu0 %v1936_v14  ;;  %2033 = vmatpush1.bf16.msra.mxu1 %v1936_v14 }
 0x1f0   :  { %v783_v55 = vadd.f32 %v1860_v51, %v462_v42  ;;  %v777_v19 = vpop.f32.mrb[15].mxu0  ;;  %1938 = vmatprep.subr.bf16.mxu0 %v2105_v5  ;;  %2018 = vmatprep.subr.bf16.mxu1 %v2105_v5  ;;  %v512_v42 = vpop.permute.xlu0 %511 }
 0x1f1   :  { %v1939_v40 = vpack.c.bf16 %v879_v17, %v878_v18  ;;  %v778_v21 = vadd.f32 %v777_v19, %v457_v33  ;;  %v507_v33 = vpop.permute.xlu1 %506 }
 0x1f2   :  { %v881_v23 = vmax.f32 %v783_v55, 0.0 }
 0x1f3   :  { %v880_v24 = vmax.f32 %v778_v21, 0.0  ;;  %v1863_v25 = vpop.f32.mrb[16].mxu0  ;;  %1940 = vmatpush1.bf16.msra.mxu0 %v1939_v40  ;;  %2034 = vmatpush1.bf16.msra.mxu1 %v1939_v40 }
 0x1f4   :  { %v793_v26 = vadd.f32 %v1863_v25, %v472_v57  ;;  %v787_v1 = vpop.f32.mrb[17].mxu0  ;;  %1941 = vmatprep.subr.bf16.mxu0 %v2105_v5  ;;  %2019 = vmatprep.subr.bf16.mxu1 %v2105_v5  ;;  %v522_v56 = vpop.permute.xlu0 %521 }
 0x1f5   :  { %v1942_v9 = vpack.c.bf16 %v881_v23, %v880_v24  ;;  %v788_v16 = vadd.f32 %v787_v1, %v467_v59  ;;  %v517_v44 = vpop.permute.xlu1 %516 }
 0x1f6   :  { %v883_v6 = vmax.f32 %v793_v26, 0.0 }
 0x1f7   :  { %v882_v28 = vmax.f32 %v788_v16, 0.0  ;;  %v1866_v30 = vpop.f32.mrb[18].mxu0  ;;  %1943 = vmatpush1.bf16.msra.mxu0 %v1942_v9  ;;  %2035 = vmatpush1.bf16.msra.mxu1 %v1942_v9  ;;  %v898_v16 = vld [vmem:[%s3067_s5] sm:$0xff] }
 0x1f8   :  { %v803_v31 = vadd.f32 %v1866_v30, %v482_v10  ;;  %v797_v32 = vpop.f32.mrb[19].mxu0  ;;  %1944 = vmatprep.subr.bf16.mxu0 %v2105_v5  ;;  %2020 = vmatprep.subr.bf16.mxu1 %v2105_v5  ;;  %v532_v10 = vpop.permute.xlu0 %531  ;;  %v900_v30 = vld [vmem:[%s3067_s5 + $0x10] sm:$0xff] }
 0x1f9   :  { %v1945_v34 = vpack.c.bf16 %v883_v6, %v882_v28  ;;  %v798_v29 = vadd.f32 %v797_v32, %v477_v62  ;;  %v527_v62 = vpop.permute.xlu1 %526  ;;  %v916_v6 = vld [vmem:[%s3067_s5 + $0x90] sm:$0xff]  ;;  %v919_v28 = vld [vmem:[%s3067_s5 + $0xa8] sm:$0xff]  ;;  %v921_v32 = vld [vmem:[%s3067_s5 + $0xb8] sm:$0xff] }
 0x1fa   :  { %v885_v36 = vmax.f32 %v803_v31, 0.0  ;;  %v903_v31 = vld [vmem:[%s3067_s5 + $0x28] sm:$0xff] }
 0x1fb   :  { %v884_v37 = vmax.f32 %v798_v29, 0.0  ;;  %v1869_v38 = vpop.f32.mrb[20].mxu0  ;;  %1946 = vmatpush1.bf16.msra.mxu0 %v1945_v34  ;;  %2036 = vmatpush1.bf16.msra.mxu1 %v1945_v34  ;;  %v902_v34 = vld [vmem:[%s3067_s5 + $0x20] sm:$0xff]  ;;  %v920_v29 = vld [vmem:[%s3067_s5 + $0xb0] sm:$0xff] }
 0x1fc   :  { %v813_v39 = vadd.f32 %v1869_v38, %v492_v20  ;;  %v807_v41 = vpop.f32.mrb[21].mxu0  ;;  %1947 = vmatprep.subr.bf16.mxu0 %v2105_v5  ;;  %2021 = vmatprep.subr.bf16.mxu1 %v2105_v5  ;;  %v542_v19 = vpop.permute.xlu0 %541  ;;  %v904_v38 = vld [vmem:[%s3067_s5 + $0x30] sm:$0xff] }
 0x1fd   :  { %v1948_v43 = vpack.c.bf16 %v885_v36, %v884_v37  ;;  %v808_v45 = vadd.f32 %v807_v41, %v487_v12  ;;  %v537_v21 = vpop.permute.xlu1 %536  ;;  %v905_v36 = vld [vmem:[%s3067_s5 + $0x38] sm:$0xff]  ;;  %v923_v37 = vld [vmem:[%s3067_s5 + $0xc8] sm:$0xff] }
 0x1fe   :  { %v887_v46 = vmax.f32 %v813_v39, 0.0  ;;  %v922_v39 = vld [vmem:[%s3067_s5 + $0xc0] sm:$0xff]  ;;  %v907_v41 = vld [vmem:[%s3067_s5 + $0x48] sm:$0xff] }
 0x1ff   :  { %v886_v47 = vmax.f32 %v808_v45, 0.0  ;;  %v1872_v7 = vpop.f32.mrb[22].mxu0  ;;  %1949 = vmatpush1.bf16.msra.mxu0 %v1948_v43  ;;  %2037 = vmatpush1.bf16.msra.mxu1 %v1948_v43  ;;  %v906_v43 = vld [vmem:[%s3067_s5 + $0x40] sm:$0xff]  ;;  %v924_v45 = vld [vmem:[%s3067_s5 + $0xd0] sm:$0xff] }
 0x200   :  { %v823_v48 = vadd.f32 %v1872_v7, %v502_v27  ;;  %v817_v49 = vpop.f32.mrb[23].mxu0  ;;  %1950 = vmatprep.subr.bf16.mxu0 %v2105_v5  ;;  %2022 = vmatprep.subr.bf16.mxu1 %v2105_v5  ;;  %v901_v27 = vld [vmem:[%s3067_s5 + $0x18] sm:$0xff]  ;;  %v926_v7 = vld [vmem:[%s3067_s5 + $0xe0] sm:$0xff] }
 0x201   :  { %v1951_v50 = vpack.c.bf16 %v887_v46, %v886_v47  ;;  %v818_v52 = vadd.f32 %v817_v49, %v497_v22  ;;  %v918_v22 = vld [vmem:[%s3067_s5 + $0xa0] sm:$0xff]  ;;  %v927_v46 = vld [vmem:[%s3067_s5 + $0xe8] sm:$0xff]  ;;  %v908_v47 = vld [vmem:[%s3067_s5 + $0x50] sm:$0xff] }
 0x202   :  { %v889_v54 = vmax.f32 %v823_v48, 0.0  ;;  %v911_v48 = vld [vmem:[%s3067_s5 + $0x68] sm:$0xff]  ;;  %v929_v49 = vld [vmem:[%s3067_s5 + $0xf8] sm:$0xff] }
 0x203   :  { %v888_v57 = vmax.f32 %v818_v52, 0.0  ;;  %v1875_v58 = vpop.f32.mrb[24].mxu0  ;;  %1952 = vmatpush1.bf16.msra.mxu0 %v1951_v50  ;;  %2038 = vmatpush1.bf16.msra.mxu1 %v1951_v50  ;;  %v910_v50 = vld [vmem:[%s3067_s5 + $0x60] sm:$0xff]  ;;  %v928_v52 = vld [vmem:[%s3067_s5 + $0xf0] sm:$0xff] }
 0x204   :  { %v833_v59 = vadd.f32 %v1875_v58, %v512_v42  ;;  %v827_v61 = vpop.f32.mrb[25].mxu0  ;;  %1953 = vmatprep.subr.bf16.mxu0 %v2105_v5  ;;  %2023 = vmatprep.subr.bf16.mxu1 %v2105_v5  ;;  %v925_v42 = vld [vmem:[%s3067_s5 + $0xd8] sm:$0xff]  ;;  %v930_v58 = vld [vmem:[%s3067_s5 + $0x100] sm:$0xff] }
 0x205   :  { %v1954_v63 = vpack.c.bf16 %v889_v54, %v888_v57  ;;  %v828_v0 = vadd.f32 %v827_v61, %v507_v33  ;;  %v909_v33 = vld [vmem:[%s3067_s5 + $0x58] sm:$0xff]  ;;  %v912_v57 = vld [vmem:[%s3067_s5 + $0x70] sm:$0xff]  ;;  %v914_v61 = vld [vmem:[%s3067_s5 + $0x80] sm:$0xff] }
 0x206   :  { %v891_v60 = vmax.f32 %v833_v59, 0.0  ;;  %v913_v54 = vld [vmem:[%s3067_s5 + $0x78] sm:$0xff] }
 0x207   :  { %v890_v2 = vmax.f32 %v828_v0, 0.0  ;;  %v1878_v3 = vpop.f32.mrb[26].mxu0  ;;  %1955 = vmatpush1.bf16.msra.mxu0 %v1954_v63  ;;  %2039 = vmatpush1.bf16.msra.mxu1 %v1954_v63  ;;  %v933_v59 = vld [vmem:[%s3067_s5 + $0x118] sm:$0xff]  ;;  %v932_v63 = vld [vmem:[%s3067_s5 + $0x110] sm:$0xff]  ;;  %v935_v0 = vld [vmem:[%s3067_s5 + $0x128] sm:$0xff] }
 0x208   :  { %v843_v4 = vadd.f32 %v1878_v3, %v522_v56  ;;  %v837_v8 = vpop.f32.mrb[27].mxu0  ;;  %1956 = vmatprep.subr.bf16.mxu0 %v2105_v5  ;;  %2024 = vmatprep.subr.bf16.mxu1 %v2105_v5  ;;  %v931_v56 = vld [vmem:[%s3067_s5 + $0x108] sm:$0xff]  ;;  %v936_v3 = vld [vmem:[%s3067_s5 + $0x130] sm:$0xff] }
 0x209   :  { %v1957_v35 = vpack.c.bf16 %v891_v60, %v890_v2  ;;  %v838_v11 = vadd.f32 %v837_v8, %v517_v44  ;;  %v915_v44 = vld [vmem:[%s3067_s5 + $0x88] sm:$0xff]  ;;  %v934_v60 = vld [vmem:[%s3067_s5 + $0x120] sm:$0xff]  ;;  %v937_v2 = vld [vmem:[%s3067_s5 + $0x138] sm:$0xff] }
 0x20a   :  { %v893_v53 = vmax.f32 %v843_v4, 0.0  ;;  %v939_v4 = vld [vmem:[%s3067_s5 + $0x148] sm:$0xff]  ;;  %v938_v8 = vld [vmem:[%s3067_s5 + $0x140] sm:$0xff] }
 0x20b   :  { %v892_v13 = vmax.f32 %v838_v11, 0.0  ;;  %v1881_v14 = vpop.f32.mrb[28].mxu0  ;;  %1958 = vmatpush1.bf16.msra.mxu0 %v1957_v35  ;;  %2040 = vmatpush1.bf16.msra.mxu1 %v1957_v35  ;;  %v940_v35 = vld [vmem:[%s3067_s5 + $0x150] sm:$0xff]  ;;  %v943_v11 = vld [vmem:[%s3067_s5 + $0x168] sm:$0xff] }
 0x20c   :  { %v853_v15 = vadd.f32 %v1881_v14, %v532_v10  ;;  %v847_v17 = vpop.f32.mrb[29].mxu0  ;;  %1959 = vmatprep.subr.bf16.mxu0 %v2105_v5  ;;  %2025 = vmatprep.subr.bf16.mxu1 %v2105_v5  ;;  %v941_v10 = vld [vmem:[%s3067_s5 + $0x158] sm:$0xff]  ;;  %v947_v14 = vld [vmem:[%s3067_s5 + $0x188] sm:$0xff] }
 0x20d   :  { %v1960_v18 = vpack.c.bf16 %v893_v53, %v892_v13  ;;  %v848_v51 = vadd.f32 %v847_v17, %v527_v62  ;;  %v942_v62 = vld [vmem:[%s3067_s5 + $0x160] sm:$0xff]  ;;  %v945_v53 = vld [vmem:[%s3067_s5 + $0x178] sm:$0xff]  ;;  %v944_v13 = vld [vmem:[%s3067_s5 + $0x170] sm:$0xff] }
 0x20e   :  { %v895_v55 = vmax.f32 %v853_v15, 0.0  ;;  %v946_v15 = vld [vmem:[%s3067_s5 + $0x180] sm:$0xff]  ;;  %v949_v17 = vld [vmem:[%s3067_s5 + $0x198] sm:$0xff] }
 0x20f   :  { %v894_v20 = vmax.f32 %v848_v51, 0.0  ;;  %v1884_v40 = vpop.f32.mrb[30].mxu0  ;;  %1961 = vmatpush1.bf16.msra.mxu0 %v1960_v18  ;;  %2041 = vmatpush1.bf16.msra.mxu1 %v1960_v18  ;;  %v948_v18 = vld [vmem:[%s3067_s5 + $0x190] sm:$0xff]  ;;  %v951_v51 = vld [vmem:[%s3067_s5 + $0x1a8] sm:$0xff] }
 0x210   :  { %v863_v12 = vadd.f32 %v1884_v40, %v542_v19  ;;  %v857_v23 = vpop.f32.mrb[31].mxu0  ;;  %1962 = vmatprep.subr.bf16.mxu0 %v2105_v5  ;;  %2026 = vmatprep.subr.bf16.mxu1 %v2105_v5  ;;  %v953_v19 = vld [vmem:[%s3067_s5 + $0x1b8] sm:$0xff]  ;;  %v955_v40 = vld [vmem:[%s3067_s5 + $0x1c8] sm:$0xff] }
 0x211   :  { %v1963_v24 = vpack.c.bf16 %v895_v55, %v894_v20  ;;  %v858_v25 = vadd.f32 %v857_v23, %v537_v21  ;;  %v950_v55 = vld [vmem:[%s3067_s5 + $0x1a0] sm:$0xff]  ;;  %v952_v20 = vld [vmem:[%s3067_s5 + $0x1b0] sm:$0xff] }
 0x212   :  { %v897_v26 = vmax.f32 %v863_v12, 0.0  ;;  %v954_v21 = vld [vmem:[%s3067_s5 + $0x1c0] sm:$0xff]  ;;  %v957_v12 = vld [vmem:[%s3067_s5 + $0x1d8] sm:$0xff]  ;;  %v956_v23 = vld [vmem:[%s3067_s5 + $0x1d0] sm:$0xff] }
 0x213   :  { %v896_v1 = vmax.f32 %v858_v25, 0.0  ;;  %1964 = vmatpush1.bf16.msra.mxu0 %v1963_v24  ;;  %2042 = vmatpush1.bf16.msra.mxu1 %v1963_v24  ;;  %v959_v24 = vld [vmem:[%s3067_s5 + $0x1e8] sm:$0xff]  ;;  %v958_v25 = vld [vmem:[%s3067_s5 + $0x1e0] sm:$0xff] }
 0x214   :  { %1965 = vmatprep.subr.bf16.mxu0 %v2105_v5  ;;  %2027 = vmatprep.subr.bf16.mxu1 %v2105_v5 }
 0x215   :  { %v1966_v9 = vpack.c.bf16 %v897_v26, %v896_v1  ;;  %v961_v26 = vld [vmem:[%s3067_s5 + $0x1f8] sm:$0xff]  ;;  %v960_v1 = vld [vmem:[%s3067_s5 + $0x1f0] sm:$0xff] }
 0x217   :  { %1967 = vmatpush1.bf16.msra.mxu0 %v1966_v9  ;;  %2043 = vmatpush1.bf16.msra.mxu1 %v1966_v9  ;;  %v2913_v9 = vpop.permute.xlu1 %1076 }
 0x21a   :  { %1219 = vmatmul.mubr.f32.vlgmr.msra.gmra.mrb[32].mxu0 %v898_v16  ;;  %1264 = vmatmul.mubr.f32.vlgmr.msra.gmra.mrb[0].mxu1 %v916_v6  ;;  %v2915_v16 = vpop.permute.xlu0 %1081 }
 0x21b   :  { %1223 = vmatprep.mubr.f32.mxu0 %v901_v27  ;;  %1268 = vmatprep.mubr.f32.mxu1 %v919_v28  ;;  %v997_v6 = vpop.permute.xlu1 %996 }
 0x21e   :  { %1224 = vmatmul.mubr.f32.gmra.mrb[34].mxu0 %v900_v30  ;;  %1269 = vmatmul.mubr.f32.gmra.mrb[2].mxu1 %v918_v22  ;;  %v1002_v27 = vpop.permute.xlu0 %1001 }
 0x21f   :  { %1228 = vmatprep.mubr.f32.mxu0 %v903_v31  ;;  %1273 = vmatprep.mubr.f32.mxu1 %v921_v32  ;;  %v2917_v28 = vpop.permute.xlu1 %1086 }
 0x222   :  { %1229 = vmatmul.mubr.f32.gmra.mrb[36].mxu0 %v902_v34  ;;  %1274 = vmatmul.mubr.f32.gmra.mrb[4].mxu1 %v920_v29  ;;  %v2919_v30 = vpop.permute.xlu0 %1091 }
 0x223   :  { %1233 = vmatprep.mubr.f32.mxu0 %v905_v36  ;;  %1278 = vmatprep.mubr.f32.mxu1 %v923_v37  ;;  %v1007_v22 = vpop.permute.xlu1 %1006 }
 0x226   :  { %1234 = vmatmul.mubr.f32.gmra.mrb[38].mxu0 %v904_v38  ;;  %1279 = vmatmul.mubr.f32.gmra.mrb[6].mxu1 %v922_v39  ;;  %v1012_v31 = vpop.permute.xlu0 %1011  ;;  %v1412_v39 = vld [vmem:[%s3069_s7 + $0x8] sm:$0xff] }
 0x227   :  { %1238 = vmatprep.mubr.f32.mxu0 %v907_v41  ;;  %1283 = vmatprep.mubr.f32.mxu1 %v925_v42  ;;  %v2921_v32 = vpop.permute.xlu1 %1096 }
 0x22a   :  { %1239 = vmatmul.mubr.f32.gmra.mrb[40].mxu0 %v906_v43  ;;  %1284 = vmatmul.mubr.f32.gmra.mrb[8].mxu1 %v924_v45  ;;  %v2923_v34 = vpop.permute.xlu0 %1101 }
 0x22b   :  { %1243 = vmatprep.mubr.f32.mxu0 %v909_v33  ;;  %1288 = vmatprep.mubr.f32.mxu1 %v927_v46  ;;  %v1017_v29 = vpop.permute.xlu1 %1016 }
 0x22e   :  { %1244 = vmatmul.mubr.f32.gmra.mrb[42].mxu0 %v908_v47  ;;  %1289 = vmatmul.mubr.f32.gmra.mrb[10].mxu1 %v926_v7  ;;  %v2925_v36 = vpop.permute.xlu0 %1021 }
 0x22f   :  { %1248 = vmatprep.mubr.f32.mxu0 %v911_v48  ;;  %1293 = vmatprep.mubr.f32.mxu1 %v929_v49  ;;  %v2927_v37 = vpop.permute.xlu1 %1106 }
 0x232   :  { %1249 = vmatmul.mubr.f32.gmra.mrb[44].mxu0 %v910_v50  ;;  %1294 = vmatmul.mubr.f32.gmra.mrb[12].mxu1 %v928_v52  ;;  %v2929_v38 = vpop.permute.xlu0 %1111 }
 0x233   :  { %1253 = vmatprep.mubr.f32.mxu0 %v913_v54  ;;  %1298 = vmatprep.mubr.f32.mxu1 %v931_v56  ;;  %v2934_v41 = vpop.permute.xlu1 %1026 }
 0x236   :  { %1254 = vmatmul.mubr.f32.gmra.mrb[46].mxu0 %v912_v57  ;;  %1299 = vmatmul.mubr.f32.gmra.mrb[14].mxu1 %v930_v58  ;;  %v2936_v42 = vpop.permute.xlu0 %1031 }
 0x237   :  { %1258 = vmatprep.mubr.f32.mxu0 %v915_v44  ;;  %1303 = vmatprep.mubr.f32.mxu1 %v933_v59  ;;  %v2938_v43 = vpop.permute.xlu1 %1116 }
 0x23a   :  { %1259 = vmatmul.mubr.f32.gmra.mrb[48].mxu0 %v914_v61  ;;  %1304 = vmatmul.mubr.f32.gmra.mrb[16].mxu1 %v932_v63  ;;  %v2940_v45 = vpop.permute.xlu0 %1121 }
 0x23b   :  { %1308 = vmatprep.mubr.f32.mxu1 %v935_v0  ;;  %1539 = vmatprep.mubr.f32.mxu0 %v1412_v39  ;;  %v2942_v33 = vpop.permute.xlu1 %1036 }
 0x23e   :  { %1309 = vmatmul.mubr.f32.gmra.mrb[18].mxu1 %v934_v60  ;;  %v2944_v46 = vpop.permute.xlu0 %1041 }
 0x23f   :  { %1313 = vmatprep.mubr.f32.mxu1 %v937_v2  ;;  %v2946_v47 = vpop.permute.xlu1 %1126 }
 0x242   :  { %1314 = vmatmul.mubr.f32.gmra.mrb[20].mxu1 %v936_v3  ;;  %v2948_v7 = vpop.permute.xlu0 %1131 }
 0x243   :  { %1318 = vmatprep.mubr.f32.mxu1 %v939_v4  ;;  %v1047_v48 = vpop.permute.xlu1 %1046 }
 0x246   :  { %1319 = vmatmul.mubr.f32.gmra.mrb[22].mxu1 %v938_v8  ;;  %v1052_v49 = vpop.permute.xlu0 %1051 }
 0x247   :  { %1323 = vmatprep.mubr.f32.mxu1 %v941_v10  ;;  %v2950_v50 = vpop.permute.xlu1 %1136 }
 0x24a   :  { %1324 = vmatmul.mubr.f32.gmra.mrb[24].mxu1 %v940_v35  ;;  %v2952_v52 = vpop.permute.xlu0 %1141 }
 0x24b   :  { %1328 = vmatprep.mubr.f32.mxu1 %v943_v11  ;;  %v1057_v2 = vpop.permute.xlu1 %1056 }
 0x24e   :  { %1329 = vmatmul.mubr.f32.gmra.mrb[26].mxu1 %v942_v62  ;;  %v1062_v3 = vpop.permute.xlu0 %1061 }
 0x24f   :  { %1333 = vmatprep.mubr.f32.mxu1 %v945_v53 }
 0x252   :  { %1334 = vmatmul.mubr.f32.gmra.mrb[28].mxu1 %v944_v13 }
 0x253   :  { %1338 = vmatprep.mubr.f32.mxu1 %v947_v14 }
 0x256   :  { %1339 = vmatmul.mubr.f32.gmra.mrb[30].mxu1 %v946_v15 }
 0x257   :  { %1343 = vmatprep.mubr.f32.mxu1 %v949_v17 }
 0x25a   :  { %1344 = vmatmul.mubr.f32.gmra.mrb[32].mxu1 %v948_v18 }
 0x25b   :  { %1348 = vmatprep.mubr.f32.mxu1 %v951_v51 }
 0x25e   :  { %1349 = vmatmul.mubr.f32.gmra.mrb[34].mxu1 %v950_v55 }
 0x25f   :  { %1353 = vmatprep.mubr.f32.mxu1 %v953_v19 }
 0x262   :  { %1354 = vmatmul.mubr.f32.gmra.mrb[36].mxu1 %v952_v20 }
 0x263   :  { %1358 = vmatprep.mubr.f32.mxu1 %v955_v40 }
 0x266   :  { %1359 = vmatmul.mubr.f32.gmra.mrb[38].mxu1 %v954_v21 }
 0x267   :  { %1363 = vmatprep.mubr.f32.mxu1 %v957_v12  ;;  %v2960_v12 = vpop.permute.xlu1 %1146 }
 0x26a   :  { %1364 = vmatmul.mubr.f32.gmra.mrb[40].mxu1 %v956_v23  ;;  %v2962_v23 = vpop.permute.xlu0 %1151 }
 0x26b   :  { %1368 = vmatprep.mubr.f32.mxu1 %v959_v24 }
 0x26e   :  { %1369 = vmatmul.mubr.f32.gmra.mrb[42].mxu1 %v958_v25 }
 0x26f   :  { %1373 = vmatprep.mubr.f32.mxu1 %v961_v26 }
 0x272   :  { %1374 = vmatmul.mubr.f32.gmra.mrb[44].mxu1 %v960_v1 }
 0x2ed   :  { %v1220_v54 = vpop.f32.mrb[32].mxu0  ;;  %v2954_v56 = vpop.f32.mrb[0].mxu1 }
 0x2ee   :  { %v1267_v57 = vpop.f32.mrb[1].mxu1  ;;  %v1222_v58 = vpop.f32.mrb[33].mxu0  ;;  %v1221_v44 = vadd.f32 %v1220_v54, %v997_v6 }
 0x2f0   :  { %v1379_v4 = vmax.f32 %v1221_v44, 0.0 }
 0x2f1   :  { %v1225_v59 = vpop.f32.mrb[34].mxu0  ;;  %v1270_v61 = vpop.f32.mrb[2].mxu1 }
 0x2f2   :  { %v1226_v63 = vadd.f32 %v1225_v59, %v1002_v27  ;;  %v1272_v0 = vpop.f32.mrb[3].mxu1  ;;  %v1227_v60 = vpop.f32.mrb[35].mxu0  ;;  %v1271_v10 = vadd.f32 %v1270_v61, %v1047_v48 }
 0x2f3   :  { %v1067_v0 = vpop.permute.xlu1 %1066  ;;  %v1072_v60 = vpop.permute.xlu0 %1071 }
 0x2f4   :  { %v1380_v8 = vmax.f32 %v1226_v63, 0.0  ;;  %v1389_v15 = vmax.f32 %v1271_v10, 0.0 }
 0x2f5   :  { %v1230_v35 = vpop.f32.mrb[36].mxu0  ;;  %v1275_v11 = vpop.f32.mrb[4].mxu1 }
 0x2f6   :  { %v2956_v62 = vpack.c.bf16 %v1380_v8, %v1379_v4  ;;  %v1276_v53 = vadd.f32 %v1275_v11, %v1052_v49  ;;  %v1277_v13 = vpop.f32.mrb[5].mxu1  ;;  %v1232_v14 = vpop.f32.mrb[37].mxu0  ;;  %v1231_v17 = vadd.f32 %v1230_v35, %v1007_v22 }
 0x2f8   :  { %v1390_v18 = vmax.f32 %v1276_v53, 0.0  ;;  %v1381_v24 = vmax.f32 %v1231_v17, 0.0 }
 0x2f9   :  { %v1235_v51 = vpop.f32.mrb[38].mxu0  ;;  %v1280_v55 = vpop.f32.mrb[6].mxu1 }
 0x2fa   :  { %v2958_v19 = vpack.c.bf16 %v1390_v18, %v1389_v15  ;;  %v1236_v20 = vadd.f32 %v1235_v51, %v1012_v31  ;;  %v1282_v40 = vpop.f32.mrb[7].mxu1  ;;  %v1237_v21 = vpop.f32.mrb[39].mxu0  ;;  %v1281_v26 = vadd.f32 %v1280_v55, %v1057_v2 }
 0x2fb   :  { %v1266_v40 = vadd.f32 %v2954_v56, %v2944_v46 }
 0x2fc   :  { %v1382_v25 = vmax.f32 %v1236_v20, 0.0  ;;  %v1391_v49 = vmax.f32 %v1281_v26, 0.0 }
 0x2fd   :  { %v1240_v1 = vpop.f32.mrb[40].mxu0  ;;  %v1285_v6 = vpop.f32.mrb[8].mxu1 }
 0x2fe   :  { %v2964_v27 = vpack.c.bf16 %v1382_v25, %v1381_v24  ;;  %v1286_v22 = vadd.f32 %v1285_v6, %v1062_v3  ;;  %v1287_v39 = vpop.f32.mrb[9].mxu1  ;;  %v1242_v48 = vpop.f32.mrb[41].mxu0  ;;  %v1241_v54 = vadd.f32 %v1240_v1, %v1017_v29 }
 0x300   :  { %v1392_v57 = vmax.f32 %v1286_v22, 0.0  ;;  %v1383_v2 = vmax.f32 %v1241_v54, 0.0 }
 0x301   :  { %v1245_v31 = vpop.f32.mrb[42].mxu0  ;;  %v1290_v58 = vpop.f32.mrb[10].mxu1 }
 0x302   :  { %v2966_v44 = vpack.c.bf16 %v1392_v57, %v1391_v49  ;;  %v1246_v59 = vadd.f32 %v1245_v31, %v2925_v36  ;;  %v1292_v61 = vpop.f32.mrb[11].mxu1  ;;  %v1247_v63 = vpop.f32.mrb[43].mxu0  ;;  %v1291_v8 = vadd.f32 %v1290_v58, %v1067_v0  ;;  %v1388_v49 = vmax.f32 %v1266_v40, 0.0 }
 0x304   :  { %v1384_v4 = vmax.f32 %v1246_v59, 0.0  ;;  %v1393_v13 = vmax.f32 %v1291_v8, 0.0 }
 0x305   :  { %v1250_v10 = vpop.f32.mrb[44].mxu0  ;;  %v1295_v3 = vpop.f32.mrb[12].mxu1 }
 0x306   :  { %v1978_v35 = vpack.c.bf16 %v1384_v4, %v1383_v2  ;;  %v1296_v11 = vadd.f32 %v1295_v3, %v1072_v60  ;;  %v1297_v53 = vpop.f32.mrb[13].mxu1  ;;  %v1252_v29 = vpop.f32.mrb[45].mxu0  ;;  %v1251_v14 = vadd.f32 %v1250_v10, %v2934_v41 }
 0x308   :  { %v1394_v15 = vmax.f32 %v1296_v11, 0.0  ;;  %v1385_v21 = vmax.f32 %v1251_v14, 0.0 }
 0x309   :  { %v1255_v17 = vpop.f32.mrb[46].mxu0  ;;  %v1300_v18 = vpop.f32.mrb[14].mxu1 }
 0x30a   :  { %v2970_v36 = vpack.c.bf16 %v1394_v15, %v1393_v13  ;;  %v1256_v51 = vadd.f32 %v1255_v17, %v2936_v42  ;;  %v1302_v55 = vpop.f32.mrb[15].mxu1  ;;  %v1257_v20 = vpop.f32.mrb[47].mxu0  ;;  %v1301_v25 = vadd.f32 %v1300_v18, %v2913_v9 }
 0x30c   :  { %v1386_v24 = vmax.f32 %v1256_v51, 0.0  ;;  %v1395_v42 = vmax.f32 %v1301_v25, 0.0 }
 0x30d   :  { %v1260_v26 = vpop.f32.mrb[48].mxu0  ;;  %v1305_v1 = vpop.f32.mrb[16].mxu1 }
 0x30e   :  { %v1982_v6 = vpack.c.bf16 %v1386_v24, %v1385_v21  ;;  %v1261_v41 = vadd.f32 %v1260_v26, %v2942_v33  ;;  %v1306_v22 = vadd.f32 %v1305_v1, %v2915_v16  ;;  %v1307_v39 = vpop.f32.mrb[17].mxu1  ;;  %v1262_v48 = vpop.f32.mrb[49].mxu0 }
 0x310   :  { %v1387_v54 = vmax.f32 %v1261_v41, 0.0  ;;  %v1396_v57 = vmax.f32 %v1306_v22, 0.0 }
 0x311   :  { %v1310_v31 = vpop.f32.mrb[18].mxu1 }
 0x312   :  { %v1986_v58 = vpack.c.bf16 %v1388_v49, %v1387_v54  ;;  %v1968_v46 = vpack.c.bf16 %v1396_v57, %v1395_v42  ;;  %v1312_v56 = vpop.f32.mrb[19].mxu1  ;;  %v1311_v59 = vadd.f32 %v1310_v31, %v2917_v28 }
 0x314   :  { %1969 = vmatprep.subr.bf16.mxu0 %v1968_v46  ;;  %v1397_v16 = vmax.f32 %v1311_v59, 0.0 }
 0x315   :  { %v1315_v9 = vpop.f32.mrb[20].mxu1  ;;  %1971 = vmatpush3.bf16.msra.mxu0 %v2956_v62 }
 0x316   :  { %v1316_v33 = vadd.f32 %v1315_v9, %v2919_v30  ;;  %v1317_v61 = vpop.f32.mrb[21].mxu1 }
 0x317   :  { %v1418_v61 = vld [vmem:[%s3069_s7 + $0x38] sm:$0xff] }
 0x318   :  { %v1398_v63 = vmax.f32 %v1316_v33, 0.0 }
 0x319   :  { %v1320_v0 = vpop.f32.mrb[22].mxu1 }
 0x31a   :  { %v1972_v60 = vpack.c.bf16 %v1398_v63, %v1397_v16  ;;  %v1322_v2 = vpop.f32.mrb[23].mxu1  ;;  %v1321_v4 = vadd.f32 %v1320_v0, %v2921_v32  ;;  %v1417_v16 = vld [vmem:[%s3069_s7 + $0x30] sm:$0xff]  ;;  %v1420_v63 = vld [vmem:[%s3069_s7 + $0x48] sm:$0xff]  ;;  %v1419_v0 = vld [vmem:[%s3069_s7 + $0x40] sm:$0xff] }
 0x31b   :  { %v1421_v2 = vld [vmem:[%s3069_s7 + $0x50] sm:$0xff] }
 0x31c   :  { %1973 = vmatprep.subr.bf16.mxu0 %v1972_v60  ;;  %v1399_v3 = vmax.f32 %v1321_v4, 0.0  ;;  %v1422_v60 = vld [vmem:[%s3069_s7 + $0x58] sm:$0xff]  ;;  %v1424_v4 = vld [vmem:[%s3069_s7 + $0x68] sm:$0xff] }
 0x31d   :  { %v1325_v8 = vpop.f32.mrb[24].mxu1  ;;  %1975 = vmatpush3.bf16.msra.mxu0 %v2964_v27 }
 0x31e   :  { %v1326_v28 = vadd.f32 %v1325_v8, %v2923_v34  ;;  %v1327_v10 = vpop.f32.mrb[25].mxu1  ;;  %v1423_v8 = vld [vmem:[%s3069_s7 + $0x60] sm:$0xff] }
 0x31f   :  { %v1425_v10 = vld [vmem:[%s3069_s7 + $0x70] sm:$0xff] }
 0x320   :  { %v1400_v11 = vmax.f32 %v1326_v28, 0.0  ;;  %v1426_v28 = vld [vmem:[%s3069_s7 + $0x78] sm:$0xff] }
 0x321   :  { %v1330_v62 = vpop.f32.mrb[26].mxu1 }
 0x322   :  { %v1976_v53 = vpack.c.bf16 %v1400_v11, %v1399_v3  ;;  %v1332_v30 = vpop.f32.mrb[27].mxu1  ;;  %v1331_v29 = vadd.f32 %v1330_v62, %v2927_v37  ;;  %v2107_v3 = vmov 0.0  }
 0x324   :  { %1977 = vmatprep.subr.bf16.mxu0 %v1976_v53  ;;  %v1401_v15 = vmax.f32 %v1331_v29, 0.0  ;;  %v1438_v29 = vpop.permute.xlu1 %1437 }
 0x325   :  { %v1335_v13 = vpop.f32.mrb[28].mxu1  ;;  %1979 = vmatpush3.bf16.msra.mxu0 %v1978_v35 }
 0x326   :  { %v1336_v14 = vadd.f32 %v1335_v13, %v2929_v38  ;;  %v1337_v32 = vpop.f32.mrb[29].mxu1 }
 0x328   :  { %v1402_v17 = vmax.f32 %v1336_v14, 0.0 }
 0x329   :  { %v1340_v18 = vpop.f32.mrb[30].mxu1 }
 0x32a   :  { %v1980_v27 = vpack.c.bf16 %v1402_v17, %v1401_v15  ;;  %v1342_v51 = vpop.f32.mrb[31].mxu1  ;;  %v1341_v34 = vadd.f32 %v1340_v18, %v2938_v43  ;;  %v1443_v15 = vpop.permute.xlu0 %1442 }
 0x32c   :  { %1981 = vmatprep.subr.bf16.mxu0 %v1980_v27  ;;  %v1403_v37 = vmax.f32 %v1341_v34, 0.0 }
 0x32d   :  { %v1345_v55 = vpop.f32.mrb[32].mxu1  ;;  %1983 = vmatpush3.bf16.msra.mxu0 %v1982_v6 }
 0x32e   :  { %v1346_v20 = vadd.f32 %v1345_v55, %v2940_v45  ;;  %v1347_v40 = vpop.f32.mrb[33].mxu1 }
 0x330   :  { %v1404_v21 = vmax.f32 %v1346_v20, 0.0 }
 0x331   :  { %v1350_v24 = vpop.f32.mrb[34].mxu1 }
 0x332   :  { %v1984_v35 = vpack.c.bf16 %v1404_v21, %v1403_v37  ;;  %v1352_v25 = vpop.f32.mrb[35].mxu1  ;;  %v1351_v38 = vadd.f32 %v1350_v24, %v2946_v47  ;;  %v1448_v37 = vpop.permute.xlu1 %1447 }
 0x333   :  { %v1453_v25 = vpop.permute.xlu0 %1452 }
 0x334   :  { %1985 = vmatprep.subr.bf16.mxu0 %v1984_v35  ;;  %v1405_v43 = vmax.f32 %v1351_v38, 0.0 }
 0x335   :  { %v1355_v26 = vpop.f32.mrb[36].mxu1  ;;  %1987 = vmatpush3.bf16.msra.mxu0 %v1986_v58 }
 0x336   :  { %v1356_v1 = vadd.f32 %v1355_v26, %v2948_v7  ;;  %v1357_v41 = vpop.f32.mrb[37].mxu1 }
 0x338   :  { %v1406_v22 = vmax.f32 %v1356_v1, 0.0 }
 0x339   :  { %v1360_v39 = vpop.f32.mrb[38].mxu1 }
 0x33a   :  { %v1988_v6 = vpack.c.bf16 %v1406_v22, %v1405_v43  ;;  %v1362_v48 = vpop.f32.mrb[39].mxu1  ;;  %v1361_v45 = vadd.f32 %v1360_v39, %v2950_v50 }
 0x33b   :  { %v1458_v48 = vpop.permute.xlu1 %1457 }
 0x33c   :  { %1989 = vmatprep.subr.bf16.mxu0 %v1988_v6  ;;  %v1407_v54 = vmax.f32 %v1361_v45, 0.0 }
 0x33d   :  { %v1365_v49 = vpop.f32.mrb[40].mxu1  ;;  %1991 = vmatpush3.bf16.msra.mxu0 %v2958_v19 }
 0x33e   :  { %v1366_v42 = vadd.f32 %v1365_v49, %v2952_v52  ;;  %v1367_v47 = vpop.f32.mrb[41].mxu1  ;;  %v1411_v52 = vld [vmem:[%s3069_s7] sm:$0xff] }
 0x33f   :  { %v1463_v47 = vpop.permute.xlu0 %1462 }
 0x340   :  { %v1408_v57 = vmax.f32 %v1366_v42, 0.0 }
 0x341   :  { %v1370_v31 = vpop.f32.mrb[42].mxu1 }
 0x342   :  { %v1992_v58 = vpack.c.bf16 %v1408_v57, %v1407_v54  ;;  %v1372_v7 = vpop.f32.mrb[43].mxu1  ;;  %v1371_v46 = vadd.f32 %v1370_v31, %v2960_v12  ;;  %v1414_v12 = vld [vmem:[%s3069_s7 + $0x18] sm:$0xff] }
 0x344   :  { %1993 = vmatprep.subr.bf16.mxu0 %v1992_v58  ;;  %v1409_v9 = vmax.f32 %v1371_v46, 0.0 }
 0x345   :  { %v1375_v56 = vpop.f32.mrb[44].mxu1  ;;  %1995 = vmatpush3.bf16.msra.mxu0 %v2966_v44  ;;  %v1416_v44 = vld [vmem:[%s3069_s7 + $0x28] sm:$0xff] }
 0x346   :  { %v1376_v50 = vadd.f32 %v1375_v56, %v2962_v23  ;;  %v1377_v59 = vpop.f32.mrb[45].mxu1  ;;  %v1413_v23 = vld [vmem:[%s3069_s7 + $0x10] sm:$0xff] }
 0x347   :  { %v1468_v59 = vpop.permute.xlu1 %1467 }
 0x348   :  { %v1410_v33 = vmax.f32 %v1376_v50, 0.0 }
 0x34a   :  { %v1996_v19 = vpack.c.bf16 %v1410_v33, %v1409_v9 }
 0x34c   :  { %1997 = vmatprep.subr.bf16.mxu0 %v1996_v19 }
 0x34d   :  { %1999 = vmatpush3.bf16.msra.mxu0 %v2970_v36  ;;  %v1415_v36 = vld [vmem:[%s3069_s7 + $0x20] sm:$0xff] }
 0x34e   :  { %2000 = vmatprep.subr.bf16.mxu0 %v2105_v5 }
 0x350   :  { %1540 = vmatmul.mubr.f32.vlgmr.msra.gmra.mrb[50].mxu0 %v1411_v52  ;;  %v1473_v52 = vpop.permute.xlu0 %1472 }
 0x351   :  { %1544 = vmatprep.mubr.f32.mxu0 %v1414_v12 }
 0x354   :  { %1545 = vmatmul.mubr.f32.gmra.mrb[52].mxu0 %v1413_v23 }
 0x355   :  { %1549 = vmatprep.mubr.f32.mxu0 %v1416_v44 }
 0x358   :  { %1550 = vmatmul.mubr.f32.gmra.mrb[54].mxu0 %v1415_v36 }
 0x359   :  { %1554 = vmatprep.mubr.f32.mxu0 %v1418_v61  ;;  %v1588_v61 = vld [vmem:[%s3071_s9] sm:$0xff] }
 0x35c   :  { %1555 = vmatmul.mubr.f32.gmra.mrb[56].mxu0 %v1417_v16  ;;  %v1593_v16 = vpop.permute.xlu1 %1592 }
 0x35d   :  { %1559 = vmatprep.mubr.f32.mxu0 %v1420_v63 }
 0x360   :  { %1560 = vmatmul.mubr.f32.gmra.mrb[58].mxu0 %v1419_v0 }
 0x361   :  { %1564 = vmatprep.mubr.f32.mxu0 %v1422_v60 }
 0x364   :  { %1565 = vmatmul.mubr.f32.gmra.mrb[60].mxu0 %v1421_v2 }
 0x365   :  { %1569 = vmatprep.mubr.f32.mxu0 %v1424_v4 }
 0x368   :  { %1570 = vmatmul.mubr.f32.gmra.mrb[62].mxu0 %v1423_v8 }
 0x369   :  { %1574 = vmatprep.mubr.f32.mxu0 %v1426_v28 }
 0x36c   :  { %1575 = vmatmul.mubr.f32.gmra.mrb[64].mxu0 %v1425_v10 }
 0x36d   :  { %1901 = vmatprep.mubr.msk.f32.mxu0 %vm2106_vm1, %v2107_v3 }
 0x423   :  { %v1788_v11 = vpop.f32.mrb[50].mxu0 }
 0x424   :  { %v1789_v62 = vpop.f32.mrb[51].mxu0 }
 0x425   :  { %v1790_v53 = vadd.f32 %v1789_v62, %v1788_v11 }
 0x427   :  { %v1791_v30 = vpop.f32.mrb[52].mxu0  ;;  %v1542_v14 = vadd.f32 %v1790_v53, %v1438_v29 }
 0x428   :  { %v1792_v13 = vpop.f32.mrb[53].mxu0 }
 0x429   :  { %v1793_v32 = vadd.f32 %v1792_v13, %v1791_v30  ;;  %v1580_v51 = vmax.f32 %v1542_v14, 0.0 }
 0x42b   :  { %v1547_v17 = vadd.f32 %v1793_v32, %v1443_v15  ;;  %v1794_v18 = vpop.f32.mrb[54].mxu0 }
 0x42c   :  { %v1795_v27 = vpop.f32.mrb[55].mxu0 }
 0x42d   :  { %v1581_v34 = vmax.f32 %v1547_v17, 0.0  ;;  %v1796_v55 = vadd.f32 %v1795_v27, %v1794_v18 }
 0x42f   :  { %v2001_v20 = vpack.c.bf16 %v1581_v34, %v1580_v51  ;;  %v1797_v40 = vpop.f32.mrb[56].mxu0  ;;  %v1552_v24 = vadd.f32 %v1796_v55, %v1448_v37 }
 0x430   :  { %v1798_v21 = vpop.f32.mrb[57].mxu0 }
 0x431   :  { %v1799_v35 = vadd.f32 %v1798_v21, %v1797_v40  ;;  %2002 = vmatpush3.bf16.msra.mxu0 %v2001_v20  ;;  %v1582_v41 = vmax.f32 %v1552_v24, 0.0 }
 0x432   :  { %2003 = vmatprep.subr.bf16.mxu0 %v2105_v5 }
 0x433   :  { %v1557_v38 = vadd.f32 %v1799_v35, %v1453_v25  ;;  %v1800_v26 = vpop.f32.mrb[58].mxu0 }
 0x434   :  { %v1801_v1 = vpop.f32.mrb[59].mxu0 }
 0x435   :  { %v1583_v43 = vmax.f32 %v1557_v38, 0.0  ;;  %v1802_v22 = vadd.f32 %v1801_v1, %v1800_v26 }
 0x437   :  { %v2004_v39 = vpack.c.bf16 %v1583_v43, %v1582_v41  ;;  %v1803_v6 = vpop.f32.mrb[60].mxu0  ;;  %v1562_v49 = vadd.f32 %v1802_v22, %v1458_v48 }
 0x438   :  { %v1804_v45 = vpop.f32.mrb[61].mxu0 }
 0x439   :  { %v1805_v42 = vadd.f32 %v1804_v45, %v1803_v6  ;;  %2005 = vmatpush3.bf16.msra.mxu0 %v2004_v39  ;;  %v1584_v58 = vmax.f32 %v1562_v49, 0.0 }
 0x43a   :  { %2006 = vmatprep.subr.bf16.mxu0 %v2105_v5 }
 0x43b   :  { %v1567_v54 = vadd.f32 %v1805_v42, %v1463_v47  ;;  %v1806_v57 = vpop.f32.mrb[62].mxu0 }
 0x43c   :  { %v1807_v31 = vpop.f32.mrb[63].mxu0 }
 0x43d   :  { %v1585_v7 = vmax.f32 %v1567_v54, 0.0  ;;  %v1808_v46 = vadd.f32 %v1807_v31, %v1806_v57 }
 0x43f   :  { %v2007_v56 = vpack.c.bf16 %v1585_v7, %v1584_v58  ;;  %v1809_v50 = vpop.f32.mrb[64].mxu0  ;;  %v1572_v33 = vadd.f32 %v1808_v46, %v1468_v59 }
 0x440   :  { %v1810_v9 = vpop.f32.mrb[65].mxu0 }
 0x441   :  { %v1811_v19 = vadd.f32 %v1810_v9, %v1809_v50  ;;  %2008 = vmatpush3.bf16.msra.mxu0 %v2007_v56  ;;  %v1586_v23 = vmax.f32 %v1572_v33, 0.0 }
 0x442   :  { %2009 = vmatprep.subr.bf16.mxu0 %v2105_v5 }
 0x443   :  { %v1577_v12 = vadd.f32 %v1811_v19, %v1473_v52 }
 0x445   :  { %v1587_v44 = vmax.f32 %v1577_v12, 0.0 }
 0x447   :  { %v2010_v36 = vpack.c.bf16 %v1587_v44, %v1586_v23 }
 0x449   :  { %2011 = vmatpush3.bf16.msra.mxu0 %v2010_v36 }
 0x44c   :  { %1902 = vmatmul.mubr.msk.f32.vlgmr.msra.gmra.mrb[66].mxu0 %vm544_vm0, %v1588_v61 }
 0x51f   :  { %v1664_v63 = vpop.f32.mrb[66].mxu0 }
 0x520   :  { %v1665_v0 = vadd.f32 %v1664_v63, %v1593_v16  ;;  %v1903_v60 = vpop.f32.mrb[67].mxu0 }
 0x522   :  { %1668 = vst [vmem:[#allocation2] sm:$0xff] %v1665_v0 }
 0x523   :  { %2088 = shalt.err (!%p2085_p4)
}
 0x524   :  { %s2089_s9 = scalar_lea.hbm %s3073_s11, 128 }
 0x525   :  { %p2090_p5 = scmp.ne.s32.totalorder %s3073_s11, %s2089_s9  ;;  %p2093_p6 = scmp.lt.u32.totalorder %s2089_s9, %s3073_s11 }
 0x527   :  { %p2095_p7 = pnand %p2093_p6, %p2090_p5 }
 0x529   :  { %2098 = shalt.err (!%p2095_p7)
}
 0x52a   :  { %1678 = dma.vmem_to_hbm [thread:$0]  %s1676_s13, 128, %s3073_s11, [#allocation3]  }
 0x52b   :  { %2099 = dma.done.wait [#allocation3], 128  }
 0x52c   :  { %2100 = vsyncadd [#allocation3], 4294967168 }
 0x52d   :  { %1682 = vsyncpa [#allocation3], 1 }

</bundles_post_ra>
